<compile_context>
chip_gen: v7x
topology: tpu7x:2x2x1
jax: 0.10.0
libtpu: 0.0.40
codegen_flags: <defaults>
</compile_context>

<pallas_src>
import functools

import jax
import jax.numpy as jnp
from jax import lax
from jax.experimental import pallas as pl
from jax.experimental.pallas import tpu as pltpu


def _round_up(x, m):
    return ((x + m - 1) // m) * m


def _mlp_resnet_kernel(num_layers, seq_len, inv_s,
                       src_ref, emb_ref, wh_ref, bh_ref, wo_ref, bo_ref,
                       out_ref):
    # src_ref: (bm, S)  int32 token ids
    # emb_ref: (V, H)   bf16 (f32 if S > 256)
    # wh_ref:  (H, H)   bf16, pre-transposed to (in, out)
    # bh_ref:  (1, H)   f32
    # wo_ref:  (H, Op)  bf16, pre-transposed to (in, out), lane-padded
    # bo_ref:  (1, Op)  f32, lane-padded
    # out_ref: (bm, Op) f32
    bm = out_ref.shape[0]
    V, H = emb_ref.shape

    # --- fused nn.Embedding + mean(dim=1):
    # counts[b, v] = #occurrences of token v in src[b]; mean = (counts @ emb)/S.
    src_i = src_ref[...]                                       # (bm, S) int32
    vocab_iota = lax.broadcasted_iota(jnp.int32, (bm, V), 1)   # (bm, V)
    counts = jnp.zeros((bm, V), jnp.float32)
    # seq_len is a small static int -> unrolled VPU compare/accumulate.
    # TODO(synk): for very long sequences switch this to a fori_loop (or a
    # tiled one-hot matmul) instead of S unrolled compares.
    for s in range(seq_len):
        counts = counts + (vocab_iota == src_i[:, s:s + 1]).astype(jnp.float32)

    mean_emb = jnp.dot(counts.astype(emb_ref.dtype), emb_ref[...],
                       preferred_element_type=jnp.float32) * inv_s  # (bm, H) f32
    residual = mean_emb

    wh = wh_ref[...]                                   # (H, H) bf16
    bh_b = jnp.broadcast_to(bh_ref[...], (bm, H))      # hoisted once (no per-layer broadcast)

    out = mean_emb
    # num_layers is a small static int -> unrolled loop.
    for _ in range(num_layers):
        h = jnp.dot(out.astype(jnp.bfloat16), wh,
                    preferred_element_type=jnp.float32)
        out = jnp.maximum(h + bh_b, 0.0)
        out = jnp.maximum(out + residual, 0.0)

    logits = jnp.dot(out.astype(jnp.bfloat16), wo_ref[...],
                     preferred_element_type=jnp.float32)
    # Output bias used exactly once -> add it here (no broadcast kept live
    # across the layer loop).
    out_ref[...] = (logits + bo_ref[...]).astype(out_ref.dtype)


def mlp_resnet_forward(src, emb_table, w_hidden, b_hidden, w_out, b_out,
                       num_layers, *, block_b=None):
    """src: (B, S) int32 token ids. Returns (B, tgt_vocab) float32 logits.

    NOTE: the torch module's host-side asserts on src dtype / index range have
    no in-kernel equivalent; token ids are assumed valid (out-of-range ids
    silently contribute nothing to the in-kernel counts).
    """
    B, S = src.shape
    V, H = emb_table.shape
    O = w_out.shape[0]

    # Lane-dense output: pad the class dim to a multiple of 128 (unmasked vst).
    O_pad = _round_up(O, 128)

    # Batch tiling: fill the MXU M dimension.  One grid step for small/medium
    # B; for large B use 512 (multiple of 128 -> friendly to v5e's 4x128^2 MXU)
    # which also yields >= 2 "parallel" steps sharded across v7x's two TCs.
    if block_b is None:
        block_b = _round_up(B, 8) if B <= 512 else 512
    B_pad = _round_up(B, block_b)

    src_p = src.astype(jnp.int32)
    if B_pad != B:
        src_p = jnp.pad(src_p, ((0, B_pad - B), (0, 0)))   # pad rows sliced off below

    # bf16 MXU operands with f32 accumulation.  Counts (built in-kernel) are
    # exact in bf16 only while counts <= 256 (i.e. S <= 256); otherwise keep
    # the table (and counts) in f32.
    emb_dtype = jnp.bfloat16 if S <= 256 else jnp.float32
    emb_itemsize = 2 if emb_dtype == jnp.bfloat16 else 4
    emb_in = emb_table.astype(emb_dtype)                 # (V, H)
    wh_t = w_hidden.T.astype(jnp.bfloat16)               # (H, H)   (in, out)
    wo_t = w_out.T.astype(jnp.bfloat16)                  # (H, O)   (in, out)
    bh = b_hidden.reshape(1, H).astype(jnp.float32)
    bo = b_out.reshape(1, O).astype(jnp.float32)
    if O_pad != O:
        wo_t = jnp.pad(wo_t, ((0, 0), (0, O_pad - O)))
        bo = jnp.pad(bo, ((0, 0), (0, O_pad - O)))

    # --- VMEM budget guard (v7x: 64 MiB physical, ~32 MiB default scoped).
    invariant_bytes = (V * H * emb_itemsize + H * H * 2 + H * O_pad * 2
                       + (H + O_pad) * 4)
    step_bytes = block_b * (S * 4 + O_pad * 4)
    vmem_est = 2 * invariant_bytes + 2 * step_bytes      # worst case: everything double-buffered
    vmem_limit = None
    if vmem_est > 32 * 1024 * 1024:
        vmem_limit = min(int(vmem_est * 5 // 4), 100 * 1024 * 1024)
    # TODO(synk): if V*H ever approaches v7x's 64 MiB budget, add an
    # "arbitrary" grid axis over V and K-tile the counts@emb matmul (or DMA-
    # gather embedding rows) instead of holding the full table in VMEM.

    grid = (B_pad // block_b,)
    kernel = functools.partial(_mlp_resnet_kernel, num_layers, S, 1.0 / S)
    args = (src_p, emb_in, wh_t, bh, wo_t, bo)

    def run(single_buffer_invariants):
        if single_buffer_invariants:
            # Grid-invariant operands: their index_map is constant across the
            # grid, so double-buffering them is pure VMEM waste.
            def inv(shape):
                return pl.BlockSpec(shape, lambda i: (0, 0),
                                    pipeline_mode=pl.Buffered(1))
        else:
            def inv(shape):
                return pl.BlockSpec(shape, lambda i: (0, 0))
        return pl.pallas_call(
            kernel,
            out_shape=jax.ShapeDtypeStruct((B_pad, O_pad), jnp.float32),
            grid_spec=pl.GridSpec(
                grid=grid,
                in_specs=[
                    pl.BlockSpec((block_b, S), lambda i: (i, 0)),   # src tile
                    inv((V, H)),        # embedding table
                    inv((H, H)),        # hidden weight (in, out)
                    inv((1, H)),        # hidden bias
                    inv((H, O_pad)),    # output weight (in, out)
                    inv((1, O_pad)),    # output bias
                ],
                out_specs=pl.BlockSpec((block_b, O_pad), lambda i: (i, 0)),
            ),
            compiler_params=pltpu.CompilerParams(
                dimension_semantics=("parallel",),
                vmem_limit_bytes=vmem_limit),
        )(*args)

    try:
        out = jax.block_until_ready(run(True))
    except Exception:
        # pipeline_mode=pl.Buffered(1) unsupported on this Pallas version ->
        # fall back to the default (double-buffered) specs.
        out = run(False)
    return out[:B, :O]


def mlp_resnet_mirror(src, emb_table, w_hidden, b_hidden, w_out, b_out,
                      num_layers):
    """Plain-JAX mirror of the kernel's exact numerics (bf16 operands, f32 acc)."""
    B, S = src.shape
    V, H = emb_table.shape
    emb_dtype = jnp.bfloat16 if S <= 256 else jnp.float32
    counts = (src[:, :, None] == jnp.arange(V)[None, None, :]).astype(
        jnp.float32).sum(axis=1)                                    # (B, V)
    mean_emb = jnp.dot(counts.astype(emb_dtype), emb_table.astype(emb_dtype),
                       preferred_element_type=jnp.float32) * (1.0 / S)
    residual = mean_emb
    wh_t = w_hidden.T.astype(jnp.bfloat16)
    wo_t = w_out.T.astype(jnp.bfloat16)
    out = mean_emb
    for _ in range(num_layers):
        h = jnp.dot(out.astype(jnp.bfloat16), wh_t,
                    preferred_element_type=jnp.float32)
        out = jnp.maximum(h + b_hidden.reshape(1, H).astype(jnp.float32), 0.0)
        out = jnp.maximum(out + residual, 0.0)
    logits = jnp.dot(out.astype(jnp.bfloat16), wo_t,
                     preferred_element_type=jnp.float32)
    return logits + b_out.reshape(1, -1).astype(jnp.float32)


def mlp_resnet_reference(src, emb_table, w_hidden, b_hidden, w_out, b_out,
                         num_layers):
    """Pure-f32 reference following the PyTorch module structure."""
    embedded = jnp.take(emb_table, src, axis=0)
    out = embedded.mean(axis=1)
    residual = out
    for _ in range(num_layers):
        out = out @ w_hidden.T + b_hidden
        out = jnp.maximum(out, 0.0)
        out = out + residual
        out = jnp.maximum(out, 0.0)
    return out @ w_out.T + b_out


if __name__ == "__main__":
    # hyper-parameters (small, consistent with the module's __init__)
    src_vocab_size = 64     # input_size  (embedding rows)
    res_hidden     = 128    # hidden_size
    tgt_vocab_size = 128    # output_size
    num_layers     = 3
    batch, seq     = 16, 8

    key = jax.random.PRNGKey(0)
    k_src, k_emb, k_wh, k_bh, k_wo, k_bo = jax.random.split(key, 6)

    emb_table = jax.random.normal(k_emb, (src_vocab_size, res_hidden),
                                  jnp.float32) * 0.1
    w_hidden = jax.random.normal(k_wh, (res_hidden, res_hidden),
                                 jnp.float32) * 0.05
    b_hidden = jax.random.normal(k_bh, (res_hidden,), jnp.float32) * 0.05
    w_out = jax.random.normal(k_wo, (tgt_vocab_size, res_hidden),
                              jnp.float32) * 0.05
    b_out = jax.random.normal(k_bo, (tgt_vocab_size,), jnp.float32) * 0.05

    # integer token ids (torch.long equivalent)
    src = jax.random.randint(k_src, (batch, seq), 0, src_vocab_size, jnp.int32)

    out = mlp_resnet_forward(src, emb_table, w_hidden, b_hidden, w_out, b_out,
                             num_layers)
    out = jax.block_until_ready(out)
    assert out.shape == (batch, tgt_vocab_size)

    # 1) tight check: kernel vs plain-JAX mirror of the same bf16/f32 numerics
    mirror = mlp_resnet_mirror(src, emb_table, w_hidden, b_hidden, w_out,
                               b_out, num_layers)
    assert jnp.allclose(out, mirror, atol=1e-4, rtol=1e-4), \
        "mismatch vs mirrored-precision reference"

    # 2) semantic check: vs the pure-f32 PyTorch-style reference
    #    (looser tolerance only because weights/activations feed the MXU as bf16)
    ref = mlp_resnet_reference(src, emb_table, w_hidden, b_hidden, w_out,
                               b_out, num_layers)
    assert jnp.allclose(out, ref, atol=5e-3, rtol=5e-3), \
        "mismatch vs f32 module reference"

    print("KERNEL_OK")
</pallas_src>

<mosaic_0001>
module attributes {stable_mosaic.version = 11 : i64} {
  func.func @_mlp_resnet_kernel(%arg0: i32, %arg1: memref<16x8xi32, #tpu.memory_space<vmem>>, %arg2: memref<64x128xbf16, #tpu.memory_space<vmem>>, %arg3: memref<128x128xbf16, #tpu.memory_space<vmem>>, %arg4: memref<1x128xf32, #tpu.memory_space<vmem>>, %arg5: memref<128x128xbf16, #tpu.memory_space<vmem>>, %arg6: memref<1x128xf32, #tpu.memory_space<vmem>>, %arg7: memref<16x128xf32, #tpu.memory_space<vmem>>) attributes {dimension_semantics = [#tpu.dimension_semantics<parallel>], iteration_bounds = array<i64: 1>, scalar_prefetch = 0 : i64, scratch_operands = 0 : i64, tpu.core_type = #tpu.core_type<tc>, window_params = [{transform_indices = @transform_0, window_bounds = array<i64: 16, 8>}, {pipeline_mode = #tpu.pipeline_mode<synchronous>, transform_indices = @transform_1, window_bounds = array<i64: 64, 128>}, {pipeline_mode = #tpu.pipeline_mode<synchronous>, transform_indices = @transform_2, window_bounds = array<i64: 128, 128>}, {pipeline_mode = #tpu.pipeline_mode<synchronous>, transform_indices = @transform_3, window_bounds = array<i64: 1, 128>}, {pipeline_mode = #tpu.pipeline_mode<synchronous>, transform_indices = @transform_4, window_bounds = array<i64: 128, 128>}, {pipeline_mode = #tpu.pipeline_mode<synchronous>, transform_indices = @transform_5, window_bounds = array<i64: 1, 128>}, {transform_indices = @transform_6, window_bounds = array<i64: 16, 128>}]} {
    %c0 = arith.constant 0 : index
    %c0_0 = arith.constant 0 : index
    %0 = vector.load %arg1[%c0, %c0_0] : memref<16x8xi32, #tpu.memory_space<vmem>>, vector<16x8xi32>
    %1 = tpu.iota {dimensions = array<i32: 1>} : vector<16x64xi32>
    %cst = arith.constant 0.000000e+00 : f32
    %2 = vector.broadcast %cst : f32 to vector<16x64xf32>
    %3 = vector.extract_strided_slice %0 {offsets = [0, 0], sizes = [16, 1], strides = [1, 1]} : vector<16x8xi32> to vector<16x1xi32>
    %4 = vector.broadcast %3 : vector<16x1xi32> to vector<16x64xi32>
    %5 = arith.cmpi eq, %1, %4 : vector<16x64xi32>
    %6 = arith.extui %5 : vector<16x64xi1> to vector<16x64xi32>
    %7 = arith.sitofp %6 : vector<16x64xi32> to vector<16x64xf32>
    %8 = arith.addf %2, %7 : vector<16x64xf32>
    %9 = vector.extract_strided_slice %0 {offsets = [0, 1], sizes = [16, 1], strides = [1, 1]} : vector<16x8xi32> to vector<16x1xi32>
    %10 = vector.broadcast %9 : vector<16x1xi32> to vector<16x64xi32>
    %11 = arith.cmpi eq, %1, %10 : vector<16x64xi32>
    %12 = arith.extui %11 : vector<16x64xi1> to vector<16x64xi32>
    %13 = arith.sitofp %12 : vector<16x64xi32> to vector<16x64xf32>
    %14 = arith.addf %8, %13 : vector<16x64xf32>
    %15 = vector.extract_strided_slice %0 {offsets = [0, 2], sizes = [16, 1], strides = [1, 1]} : vector<16x8xi32> to vector<16x1xi32>
    %16 = vector.broadcast %15 : vector<16x1xi32> to vector<16x64xi32>
    %17 = arith.cmpi eq, %1, %16 : vector<16x64xi32>
    %18 = arith.extui %17 : vector<16x64xi1> to vector<16x64xi32>
    %19 = arith.sitofp %18 : vector<16x64xi32> to vector<16x64xf32>
    %20 = arith.addf %14, %19 : vector<16x64xf32>
    %21 = vector.extract_strided_slice %0 {offsets = [0, 3], sizes = [16, 1], strides = [1, 1]} : vector<16x8xi32> to vector<16x1xi32>
    %22 = vector.broadcast %21 : vector<16x1xi32> to vector<16x64xi32>
    %23 = arith.cmpi eq, %1, %22 : vector<16x64xi32>
    %24 = arith.extui %23 : vector<16x64xi1> to vector<16x64xi32>
    %25 = arith.sitofp %24 : vector<16x64xi32> to vector<16x64xf32>
    %26 = arith.addf %20, %25 : vector<16x64xf32>
    %27 = vector.extract_strided_slice %0 {offsets = [0, 4], sizes = [16, 1], strides = [1, 1]} : vector<16x8xi32> to vector<16x1xi32>
    %28 = vector.broadcast %27 : vector<16x1xi32> to vector<16x64xi32>
    %29 = arith.cmpi eq, %1, %28 : vector<16x64xi32>
    %30 = arith.extui %29 : vector<16x64xi1> to vector<16x64xi32>
    %31 = arith.sitofp %30 : vector<16x64xi32> to vector<16x64xf32>
    %32 = arith.addf %26, %31 : vector<16x64xf32>
    %33 = vector.extract_strided_slice %0 {offsets = [0, 5], sizes = [16, 1], strides = [1, 1]} : vector<16x8xi32> to vector<16x1xi32>
    %34 = vector.broadcast %33 : vector<16x1xi32> to vector<16x64xi32>
    %35 = arith.cmpi eq, %1, %34 : vector<16x64xi32>
    %36 = arith.extui %35 : vector<16x64xi1> to vector<16x64xi32>
    %37 = arith.sitofp %36 : vector<16x64xi32> to vector<16x64xf32>
    %38 = arith.addf %32, %37 : vector<16x64xf32>
    %39 = vector.extract_strided_slice %0 {offsets = [0, 6], sizes = [16, 1], strides = [1, 1]} : vector<16x8xi32> to vector<16x1xi32>
    %40 = vector.broadcast %39 : vector<16x1xi32> to vector<16x64xi32>
    %41 = arith.cmpi eq, %1, %40 : vector<16x64xi32>
    %42 = arith.extui %41 : vector<16x64xi1> to vector<16x64xi32>
    %43 = arith.sitofp %42 : vector<16x64xi32> to vector<16x64xf32>
    %44 = arith.addf %38, %43 : vector<16x64xf32>
    %45 = vector.extract_strided_slice %0 {offsets = [0, 7], sizes = [16, 1], strides = [1, 1]} : vector<16x8xi32> to vector<16x1xi32>
    %46 = vector.broadcast %45 : vector<16x1xi32> to vector<16x64xi32>
    %47 = arith.cmpi eq, %1, %46 : vector<16x64xi32>
    %48 = arith.extui %47 : vector<16x64xi1> to vector<16x64xi32>
    %49 = arith.sitofp %48 : vector<16x64xi32> to vector<16x64xf32>
    %50 = arith.addf %44, %49 : vector<16x64xf32>
    %51 = arith.truncf %50 : vector<16x64xf32> to vector<16x64xbf16>
    %c0_1 = arith.constant 0 : index
    %c0_2 = arith.constant 0 : index
    %52 = vector.load %arg2[%c0_1, %c0_2] : memref<64x128xbf16, #tpu.memory_space<vmem>>, vector<64x128xbf16>
    %cst_3 = arith.constant dense<0.000000e+00> : vector<16x128xf32>
    %53 = tpu.matmul %51, %52, %cst_3 {dimension_numbers = #tpu.dot_dimension_numbers<[1], [0], [0], [1], [0, 0, 1, 1], [], []>} : vector<16x64xbf16>, vector<64x128xbf16>, vector<16x128xf32> -> vector<16x128xf32>
    %cst_4 = arith.constant 1.250000e-01 : f32
    %54 = vector.broadcast %cst_4 : f32 to vector<16x128xf32>
    %55 = arith.mulf %53, %54 : vector<16x128xf32>
    %c0_5 = arith.constant 0 : index
    %c0_6 = arith.constant 0 : index
    %56 = vector.load %arg3[%c0_5, %c0_6] : memref<128x128xbf16, #tpu.memory_space<vmem>>, vector<128x128xbf16>
    %c0_7 = arith.constant 0 : index
    %c0_8 = arith.constant 0 : index
    %57 = vector.load %arg4[%c0_7, %c0_8] : memref<1x128xf32, #tpu.memory_space<vmem>>, vector<1x128xf32>
    %58 = vector.shape_cast %57 : vector<1x128xf32> to vector<1x128xf32>
    %59 = vector.broadcast %58 : vector<1x128xf32> to vector<16x128xf32>
    %60 = arith.truncf %55 : vector<16x128xf32> to vector<16x128xbf16>
    %cst_9 = arith.constant dense<0.000000e+00> : vector<16x128xf32>
    %61 = tpu.matmul %60, %56, %cst_9 {dimension_numbers = #tpu.dot_dimension_numbers<[1], [0], [0], [1], [0, 0, 1, 1], [], []>} : vector<16x128xbf16>, vector<128x128xbf16>, vector<16x128xf32> -> vector<16x128xf32>
    %62 = arith.addf %61, %59 : vector<16x128xf32>
    %cst_10 = arith.constant 0.000000e+00 : f32
    %63 = vector.broadcast %cst_10 : f32 to vector<16x128xf32>
    %64 = arith.maximumf %62, %63 : vector<16x128xf32>
    %65 = arith.addf %64, %55 : vector<16x128xf32>
    %cst_11 = arith.constant 0.000000e+00 : f32
    %66 = vector.broadcast %cst_11 : f32 to vector<16x128xf32>
    %67 = arith.maximumf %65, %66 : vector<16x128xf32>
    %68 = arith.truncf %67 : vector<16x128xf32> to vector<16x128xbf16>
    %cst_12 = arith.constant dense<0.000000e+00> : vector<16x128xf32>
    %69 = tpu.matmul %68, %56, %cst_12 {dimension_numbers = #tpu.dot_dimension_numbers<[1], [0], [0], [1], [0, 0, 1, 1], [], []>} : vector<16x128xbf16>, vector<128x128xbf16>, vector<16x128xf32> -> vector<16x128xf32>
    %70 = arith.addf %69, %59 : vector<16x128xf32>
    %cst_13 = arith.constant 0.000000e+00 : f32
    %71 = vector.broadcast %cst_13 : f32 to vector<16x128xf32>
    %72 = arith.maximumf %70, %71 : vector<16x128xf32>
    %73 = arith.addf %72, %55 : vector<16x128xf32>
    %cst_14 = arith.constant 0.000000e+00 : f32
    %74 = vector.broadcast %cst_14 : f32 to vector<16x128xf32>
    %75 = arith.maximumf %73, %74 : vector<16x128xf32>
    %76 = arith.truncf %75 : vector<16x128xf32> to vector<16x128xbf16>
    %cst_15 = arith.constant dense<0.000000e+00> : vector<16x128xf32>
    %77 = tpu.matmul %76, %56, %cst_15 {dimension_numbers = #tpu.dot_dimension_numbers<[1], [0], [0], [1], [0, 0, 1, 1], [], []>} : vector<16x128xbf16>, vector<128x128xbf16>, vector<16x128xf32> -> vector<16x128xf32>
    %78 = arith.addf %77, %59 : vector<16x128xf32>
    %cst_16 = arith.constant 0.000000e+00 : f32
    %79 = vector.broadcast %cst_16 : f32 to vector<16x128xf32>
    %80 = arith.maximumf %78, %79 : vector<16x128xf32>
    %81 = arith.addf %80, %55 : vector<16x128xf32>
    %cst_17 = arith.constant 0.000000e+00 : f32
    %82 = vector.broadcast %cst_17 : f32 to vector<16x128xf32>
    %83 = arith.maximumf %81, %82 : vector<16x128xf32>
    %84 = arith.truncf %83 : vector<16x128xf32> to vector<16x128xbf16>
    %c0_18 = arith.constant 0 : index
    %c0_19 = arith.constant 0 : index
    %85 = vector.load %arg5[%c0_18, %c0_19] : memref<128x128xbf16, #tpu.memory_space<vmem>>, vector<128x128xbf16>
    %cst_20 = arith.constant dense<0.000000e+00> : vector<16x128xf32>
    %86 = tpu.matmul %84, %85, %cst_20 {dimension_numbers = #tpu.dot_dimension_numbers<[1], [0], [0], [1], [0, 0, 1, 1], [], []>} : vector<16x128xbf16>, vector<128x128xbf16>, vector<16x128xf32> -> vector<16x128xf32>
    %c0_21 = arith.constant 0 : index
    %c0_22 = arith.constant 0 : index
    %87 = vector.load %arg6[%c0_21, %c0_22] : memref<1x128xf32, #tpu.memory_space<vmem>>, vector<1x128xf32>
    %88 = vector.broadcast %87 : vector<1x128xf32> to vector<16x128xf32>
    %89 = arith.addf %86, %88 : vector<16x128xf32>
    %c0_23 = arith.constant 0 : index
    %c0_24 = arith.constant 0 : index
    %90 = vector.load %arg7[%c0_23, %c0_24] : memref<16x128xf32, #tpu.memory_space<vmem>>, vector<16x128xf32>
    tpu.vector_store %arg7[%c0_23, %c0_24], %89 {strides = array<i32>} : memref<16x128xf32, #tpu.memory_space<vmem>>, vector<16x128xf32>,
    return
  }
  func.func @transform_0(%arg0: i32) -> (i32, i32) {
    %c0_i32 = arith.constant 0 : i32
    %c0_i32_0 = arith.constant 0 : i32
    return %arg0, %c0_i32 : i32, i32
  }
  func.func @transform_1(%arg0: i32) -> (i32, i32) {
    %c0_i32 = arith.constant 0 : i32
    %c0_i32_0 = arith.constant 0 : i32
    %c0_i32_1 = arith.constant 0 : i32
    return %c0_i32, %c0_i32_0 : i32, i32
  }
  func.func @transform_2(%arg0: i32) -> (i32, i32) {
    %c0_i32 = arith.constant 0 : i32
    %c0_i32_0 = arith.constant 0 : i32
    %c0_i32_1 = arith.constant 0 : i32
    return %c0_i32, %c0_i32_0 : i32, i32
  }
  func.func @transform_3(%arg0: i32) -> (i32, i32) {
    %c0_i32 = arith.constant 0 : i32
    %c0_i32_0 = arith.constant 0 : i32
    %c0_i32_1 = arith.constant 0 : i32
    return %c0_i32, %c0_i32_0 : i32, i32
  }
  func.func @transform_4(%arg0: i32) -> (i32, i32) {
    %c0_i32 = arith.constant 0 : i32
    %c0_i32_0 = arith.constant 0 : i32
    %c0_i32_1 = arith.constant 0 : i32
    return %c0_i32, %c0_i32_0 : i32, i32
  }
  func.func @transform_5(%arg0: i32) -> (i32, i32) {
    %c0_i32 = arith.constant 0 : i32
    %c0_i32_0 = arith.constant 0 : i32
    %c0_i32_1 = arith.constant 0 : i32
    return %c0_i32, %c0_i32_0 : i32, i32
  }
  func.func @transform_6(%arg0: i32) -> (i32, i32) {
    %c0_i32 = arith.constant 0 : i32
    %c0_i32_0 = arith.constant 0 : i32
    return %arg0, %c0_i32 : i32, i32
  }
}

module attributes {stable_mosaic.version = 11 : i64} {
  func.func @_mlp_resnet_kernel(%arg0: i32, %arg1: memref<16x8xi32, #tpu.memory_space<vmem>>, %arg2: memref<64x128xbf16, #tpu.memory_space<vmem>>, %arg3: memref<128x128xbf16, #tpu.memory_space<vmem>>, %arg4: memref<1x128xf32, #tpu.memory_space<vmem>>, %arg5: memref<128x128xbf16, #tpu.memory_space<vmem>>, %arg6: memref<1x128xf32, #tpu.memory_space<vmem>>, %arg7: memref<16x128xf32, #tpu.memory_space<vmem>>) attributes {dimension_semantics = [#tpu.dimension_semantics<parallel>], iteration_bounds = array<i64: 1>, scalar_prefetch = 0 : i64, scratch_operands = 0 : i64, tpu.core_type = #tpu.core_type<tc>, window_params = [{transform_indices = @transform_0, window_bounds = array<i64: 16, 8>}, {pipeline_mode = #tpu.pipeline_mode<synchronous>, transform_indices = @transform_1, window_bounds = array<i64: 64, 128>}, {pipeline_mode = #tpu.pipeline_mode<synchronous>, transform_indices = @transform_2, window_bounds = array<i64: 128, 128>}, {pipeline_mode = #tpu.pipeline_mode<synchronous>, transform_indices = @transform_3, window_bounds = array<i64: 1, 128>}, {pipeline_mode = #tpu.pipeline_mode<synchronous>, transform_indices = @transform_4, window_bounds = array<i64: 128, 128>}, {pipeline_mode = #tpu.pipeline_mode<synchronous>, transform_indices = @transform_5, window_bounds = array<i64: 1, 128>}, {transform_indices = @transform_6, window_bounds = array<i64: 16, 128>}]} {
    %c0 = arith.constant 0 : index
    %c0_0 = arith.constant 0 : index
    %0 = vector.load %arg1[%c0, %c0_0] : memref<16x8xi32, #tpu.memory_space<vmem>>, vector<16x8xi32>
    %1 = tpu.iota {dimensions = array<i32: 1>} : vector<16x64xi32>
    %cst = arith.constant 0.000000e+00 : f32
    %2 = vector.broadcast %cst : f32 to vector<16x64xf32>
    %3 = vector.extract_strided_slice %0 {offsets = [0, 0], sizes = [16, 1], strides = [1, 1]} : vector<16x8xi32> to vector<16x1xi32>
    %4 = vector.broadcast %3 : vector<16x1xi32> to vector<16x64xi32>
    %5 = arith.cmpi eq, %1, %4 : vector<16x64xi32>
    %6 = arith.extui %5 : vector<16x64xi1> to vector<16x64xi32>
    %7 = arith.sitofp %6 : vector<16x64xi32> to vector<16x64xf32>
    %8 = arith.addf %2, %7 : vector<16x64xf32>
    %9 = vector.extract_strided_slice %0 {offsets = [0, 1], sizes = [16, 1], strides = [1, 1]} : vector<16x8xi32> to vector<16x1xi32>
    %10 = vector.broadcast %9 : vector<16x1xi32> to vector<16x64xi32>
    %11 = arith.cmpi eq, %1, %10 : vector<16x64xi32>
    %12 = arith.extui %11 : vector<16x64xi1> to vector<16x64xi32>
    %13 = arith.sitofp %12 : vector<16x64xi32> to vector<16x64xf32>
    %14 = arith.addf %8, %13 : vector<16x64xf32>
    %15 = vector.extract_strided_slice %0 {offsets = [0, 2], sizes = [16, 1], strides = [1, 1]} : vector<16x8xi32> to vector<16x1xi32>
    %16 = vector.broadcast %15 : vector<16x1xi32> to vector<16x64xi32>
    %17 = arith.cmpi eq, %1, %16 : vector<16x64xi32>
    %18 = arith.extui %17 : vector<16x64xi1> to vector<16x64xi32>
    %19 = arith.sitofp %18 : vector<16x64xi32> to vector<16x64xf32>
    %20 = arith.addf %14, %19 : vector<16x64xf32>
    %21 = vector.extract_strided_slice %0 {offsets = [0, 3], sizes = [16, 1], strides = [1, 1]} : vector<16x8xi32> to vector<16x1xi32>
    %22 = vector.broadcast %21 : vector<16x1xi32> to vector<16x64xi32>
    %23 = arith.cmpi eq, %1, %22 : vector<16x64xi32>
    %24 = arith.extui %23 : vector<16x64xi1> to vector<16x64xi32>
    %25 = arith.sitofp %24 : vector<16x64xi32> to vector<16x64xf32>
    %26 = arith.addf %20, %25 : vector<16x64xf32>
    %27 = vector.extract_strided_slice %0 {offsets = [0, 4], sizes = [16, 1], strides = [1, 1]} : vector<16x8xi32> to vector<16x1xi32>
    %28 = vector.broadcast %27 : vector<16x1xi32> to vector<16x64xi32>
    %29 = arith.cmpi eq, %1, %28 : vector<16x64xi32>
    %30 = arith.extui %29 : vector<16x64xi1> to vector<16x64xi32>
    %31 = arith.sitofp %30 : vector<16x64xi32> to vector<16x64xf32>
    %32 = arith.addf %26, %31 : vector<16x64xf32>
    %33 = vector.extract_strided_slice %0 {offsets = [0, 5], sizes = [16, 1], strides = [1, 1]} : vector<16x8xi32> to vector<16x1xi32>
    %34 = vector.broadcast %33 : vector<16x1xi32> to vector<16x64xi32>
    %35 = arith.cmpi eq, %1, %34 : vector<16x64xi32>
    %36 = arith.extui %35 : vector<16x64xi1> to vector<16x64xi32>
    %37 = arith.sitofp %36 : vector<16x64xi32> to vector<16x64xf32>
    %38 = arith.addf %32, %37 : vector<16x64xf32>
    %39 = vector.extract_strided_slice %0 {offsets = [0, 6], sizes = [16, 1], strides = [1, 1]} : vector<16x8xi32> to vector<16x1xi32>
    %40 = vector.broadcast %39 : vector<16x1xi32> to vector<16x64xi32>
    %41 = arith.cmpi eq, %1, %40 : vector<16x64xi32>
    %42 = arith.extui %41 : vector<16x64xi1> to vector<16x64xi32>
    %43 = arith.sitofp %42 : vector<16x64xi32> to vector<16x64xf32>
    %44 = arith.addf %38, %43 : vector<16x64xf32>
    %45 = vector.extract_strided_slice %0 {offsets = [0, 7], sizes = [16, 1], strides = [1, 1]} : vector<16x8xi32> to vector<16x1xi32>
    %46 = vector.broadcast %45 : vector<16x1xi32> to vector<16x64xi32>
    %47 = arith.cmpi eq, %1, %46 : vector<16x64xi32>
    %48 = arith.extui %47 : vector<16x64xi1> to vector<16x64xi32>
    %49 = arith.sitofp %48 : vector<16x64xi32> to vector<16x64xf32>
    %50 = arith.addf %44, %49 : vector<16x64xf32>
    %51 = arith.truncf %50 : vector<16x64xf32> to vector<16x64xbf16>
    %c0_1 = arith.constant 0 : index
    %c0_2 = arith.constant 0 : index
    %52 = vector.load %arg2[%c0_1, %c0_2] : memref<64x128xbf16, #tpu.memory_space<vmem>>, vector<64x128xbf16>
    %cst_3 = arith.constant dense<0.000000e+00> : vector<16x128xf32>
    %53 = tpu.matmul %51, %52, %cst_3 {dimension_numbers = #tpu.dot_dimension_numbers<[1], [0], [0], [1], [0, 0, 1, 1], [], []>} : vector<16x64xbf16>, vector<64x128xbf16>, vector<16x128xf32> -> vector<16x128xf32>
    %cst_4 = arith.constant 1.250000e-01 : f32
    %54 = vector.broadcast %cst_4 : f32 to vector<16x128xf32>
    %55 = arith.mulf %53, %54 : vector<16x128xf32>
    %c0_5 = arith.constant 0 : index
    %c0_6 = arith.constant 0 : index
    %56 = vector.load %arg3[%c0_5, %c0_6] : memref<128x128xbf16, #tpu.memory_space<vmem>>, vector<128x128xbf16>
    %c0_7 = arith.constant 0 : index
    %c0_8 = arith.constant 0 : index
    %57 = vector.load %arg4[%c0_7, %c0_8] : memref<1x128xf32, #tpu.memory_space<vmem>>, vector<1x128xf32>
    %58 = vector.shape_cast %57 : vector<1x128xf32> to vector<1x128xf32>
    %59 = vector.broadcast %58 : vector<1x128xf32> to vector<16x128xf32>
    %60 = arith.truncf %55 : vector<16x128xf32> to vector<16x128xbf16>
    %cst_9 = arith.constant dense<0.000000e+00> : vector<16x128xf32>
    %61 = tpu.matmul %60, %56, %cst_9 {dimension_numbers = #tpu.dot_dimension_numbers<[1], [0], [0], [1], [0, 0, 1, 1], [], []>} : vector<16x128xbf16>, vector<128x128xbf16>, vector<16x128xf32> -> vector<16x128xf32>
    %62 = arith.addf %61, %59 : vector<16x128xf32>
    %cst_10 = arith.constant 0.000000e+00 : f32
    %63 = vector.broadcast %cst_10 : f32 to vector<16x128xf32>
    %64 = arith.maximumf %62, %63 : vector<16x128xf32>
    %65 = arith.addf %64, %55 : vector<16x128xf32>
    %cst_11 = arith.constant 0.000000e+00 : f32
    %66 = vector.broadcast %cst_11 : f32 to vector<16x128xf32>
    %67 = arith.maximumf %65, %66 : vector<16x128xf32>
    %68 = arith.truncf %67 : vector<16x128xf32> to vector<16x128xbf16>
    %cst_12 = arith.constant dense<0.000000e+00> : vector<16x128xf32>
    %69 = tpu.matmul %68, %56, %cst_12 {dimension_numbers = #tpu.dot_dimension_numbers<[1], [0], [0], [1], [0, 0, 1, 1], [], []>} : vector<16x128xbf16>, vector<128x128xbf16>, vector<16x128xf32> -> vector<16x128xf32>
    %70 = arith.addf %69, %59 : vector<16x128xf32>
    %cst_13 = arith.constant 0.000000e+00 : f32
    %71 = vector.broadcast %cst_13 : f32 to vector<16x128xf32>
    %72 = arith.maximumf %70, %71 : vector<16x128xf32>
    %73 = arith.addf %72, %55 : vector<16x128xf32>
    %cst_14 = arith.constant 0.000000e+00 : f32
    %74 = vector.broadcast %cst_14 : f32 to vector<16x128xf32>
    %75 = arith.maximumf %73, %74 : vector<16x128xf32>
    %76 = arith.truncf %75 : vector<16x128xf32> to vector<16x128xbf16>
    %cst_15 = arith.constant dense<0.000000e+00> : vector<16x128xf32>
    %77 = tpu.matmul %76, %56, %cst_15 {dimension_numbers = #tpu.dot_dimension_numbers<[1], [0], [0], [1], [0, 0, 1, 1], [], []>} : vector<16x128xbf16>, vector<128x128xbf16>, vector<16x128xf32> -> vector<16x128xf32>
    %78 = arith.addf %77, %59 : vector<16x128xf32>
    %cst_16 = arith.constant 0.000000e+00 : f32
    %79 = vector.broadcast %cst_16 : f32 to vector<16x128xf32>
    %80 = arith.maximumf %78, %79 : vector<16x128xf32>
    %81 = arith.addf %80, %55 : vector<16x128xf32>
    %cst_17 = arith.constant 0.000000e+00 : f32
    %82 = vector.broadcast %cst_17 : f32 to vector<16x128xf32>
    %83 = arith.maximumf %81, %82 : vector<16x128xf32>
    %84 = arith.truncf %83 : vector<16x128xf32> to vector<16x128xbf16>
    %c0_18 = arith.constant 0 : index
    %c0_19 = arith.constant 0 : index
    %85 = vector.load %arg5[%c0_18, %c0_19] : memref<128x128xbf16, #tpu.memory_space<vmem>>, vector<128x128xbf16>
    %cst_20 = arith.constant dense<0.000000e+00> : vector<16x128xf32>
    %86 = tpu.matmul %84, %85, %cst_20 {dimension_numbers = #tpu.dot_dimension_numbers<[1], [0], [0], [1], [0, 0, 1, 1], [], []>} : vector<16x128xbf16>, vector<128x128xbf16>, vector<16x128xf32> -> vector<16x128xf32>
    %c0_21 = arith.constant 0 : index
    %c0_22 = arith.constant 0 : index
    %87 = vector.load %arg6[%c0_21, %c0_22] : memref<1x128xf32, #tpu.memory_space<vmem>>, vector<1x128xf32>
    %88 = vector.broadcast %87 : vector<1x128xf32> to vector<16x128xf32>
    %89 = arith.addf %86, %88 : vector<16x128xf32>
    %c0_23 = arith.constant 0 : index
    %c0_24 = arith.constant 0 : index
    %90 = vector.load %arg7[%c0_23, %c0_24] : memref<16x128xf32, #tpu.memory_space<vmem>>, vector<16x128xf32>
    tpu.vector_store %arg7[%c0_23, %c0_24], %89 {strides = array<i32>} : memref<16x128xf32, #tpu.memory_space<vmem>>, vector<16x128xf32>,
    return
  }
  func.func @transform_0(%arg0: i32) -> (i32, i32) {
    %c0_i32 = arith.constant 0 : i32
    %c0_i32_0 = arith.constant 0 : i32
    return %arg0, %c0_i32 : i32, i32
  }
  func.func @transform_1(%arg0: i32) -> (i32, i32) {
    %c0_i32 = arith.constant 0 : i32
    %c0_i32_0 = arith.constant 0 : i32
    %c0_i32_1 = arith.constant 0 : i32
    return %c0_i32, %c0_i32_0 : i32, i32
  }
  func.func @transform_2(%arg0: i32) -> (i32, i32) {
    %c0_i32 = arith.constant 0 : i32
    %c0_i32_0 = arith.constant 0 : i32
    %c0_i32_1 = arith.constant 0 : i32
    return %c0_i32, %c0_i32_0 : i32, i32
  }
  func.func @transform_3(%arg0: i32) -> (i32, i32) {
    %c0_i32 = arith.constant 0 : i32
    %c0_i32_0 = arith.constant 0 : i32
    %c0_i32_1 = arith.constant 0 : i32
    return %c0_i32, %c0_i32_0 : i32, i32
  }
  func.func @transform_4(%arg0: i32) -> (i32, i32) {
    %c0_i32 = arith.constant 0 : i32
    %c0_i32_0 = arith.constant 0 : i32
    %c0_i32_1 = arith.constant 0 : i32
    return %c0_i32, %c0_i32_0 : i32, i32
  }
  func.func @transform_5(%arg0: i32) -> (i32, i32) {
    %c0_i32 = arith.constant 0 : i32
    %c0_i32_0 = arith.constant 0 : i32
    %c0_i32_1 = arith.constant 0 : i32
    return %c0_i32, %c0_i32_0 : i32, i32
  }
  func.func @transform_6(%arg0: i32) -> (i32, i32) {
    %c0_i32 = arith.constant 0 : i32
    %c0_i32_0 = arith.constant 0 : i32
    return %arg0, %c0_i32 : i32, i32
  }
}

</mosaic_0001>

<bundles_post_ra>
// kernel: tpu_custom_call.1
= control target key start
LH: loop header
LB: loop body
LE: loop exit
PB: predicated region body
PF: predicated region fallthrough
CT: control target
= control target key end

     0   :  { %11 = vsyncpa [#allocation3], 0  ;;  %s1160_s0 = inlined_call_operand.vmem [shape: s32[16,8], index: 0, kind: input, shape index: {}]   ;;  %s1161_s1 = inlined_call_operand.hbm [shape: bf16[64,128], index: 1, kind: input, shape index: {}]   ;;  %s1162_s2 = inlined_call_operand.hbm [shape: bf16[128,128], index: 2, kind: input, shape index: {}]   ;;  %s1163_s3 = inlined_call_operand.vmem [shape: f32[1,128], index: 3, kind: input, shape index: {}]   ;;  %s1164_s4 = inlined_call_operand.hbm [shape: bf16[128,128], index: 4, kind: input, shape index: {}]   ;;  %s1165_s5 = inlined_call_operand.vmem [shape: f32[1,128], index: 5, kind: input, shape index: {}]   ;;  %s1166_s6 = inlined_call_operand.hbm [shape: f32[16,128], index: 6, kind: output, shape index: {}]  }
   0x1   :  { %12 = vsyncpa [#allocation6], 0 }
   0x2   :  { %13 = vsyncpa [#allocation4], 0  ;;  %s927_s21 = smov [#allocation5]   ;;  %s928_s23 = smov [#allocation2]  }
   0x3   :  { %s33_s22 = sshll.u32 %s927_s21, 4  ;;  %s21_s24 = sshll.u32 %s928_s23, 4  ;;  %s34_s22 = int_to_ptr.vmem [resolvable:$true] %s33_s22  ;;  %s980_s24 = int_to_ptr.vmem [resolvable:$true] %s21_s24 }
   0x4   :  { %s833_s27 = scalar_lea.hbm %s1162_s2, 1024 }
   0x5   :  { %p834_p0 = scmp.ne.s32.totalorder %s1162_s2, %s833_s27  ;;  %p837_p1 = scmp.lt.u32.totalorder %s833_s27, %s1162_s2 }
   0x7   :  { %p839_p2 = pnand %p837_p1, %p834_p0 }
   0x9   :  { %842 = shalt.err (!%p839_p2)
}
   0xa   :  { %s843_s8 = scalar_lea.vmem %s34_s22, 1024  ;;  %p848_p4 = scmp.lt.s32.totalorder %s34_s22, %s34_s22 }
   0xb   :  { %p844_p3 = scmp.ne.s32.totalorder %s34_s22, %s843_s8  ;;  %p849_p5 = scmp.lt.s32.totalorder %s843_s8, %s843_s8 }
   0xd   :  { %p850_p6 = por %p849_p5, %p848_p4 }
   0xf   :  { %p851_p7 = pnand %p850_p6, %p844_p3 }
  0x11   :  { %854 = shalt.err (!%p851_p7)
}
  0x12   :  { %s929_s9 = smov 64   ;;  %s930_s10 = smov 4  }
  0x13   :  { %39 = dma.hbm_to_vmem [thread:$0]  %s1162_s2, 1024, %s34_s22, [#allocation6], %s929_s9, %s929_s9, %s930_s10  }
  0x14   :  { %s855_s15 = scalar_lea.hbm %s1161_s1, 512 }
  0x15   :  { %p856_p8 = scmp.ne.s32.totalorder %s1161_s1, %s855_s15  ;;  %p859_p9 = scmp.lt.u32.totalorder %s855_s15, %s1161_s1 }
  0x17   :  { %p861_p10 = pnand %p859_p9, %p856_p8 }
  0x19   :  { %864 = shalt.err (!%p861_p10)
}
  0x1a   :  { %s865_s20 = scalar_lea.vmem %s980_s24, 512  ;;  %p870_p12 = scmp.lt.s32.totalorder %s980_s24, %s980_s24 }
  0x1b   :  { %p866_p11 = scmp.ne.s32.totalorder %s980_s24, %s865_s20  ;;  %p871_p13 = scmp.lt.s32.totalorder %s865_s20, %s865_s20 }
  0x1d   :  { %p872_p0 = por %p871_p13, %p870_p12 }
  0x1f   :  { %p873_p1 = pnand %p872_p0, %p866_p11 }
  0x21   :  { %876 = shalt.err (!%p873_p1)
}
  0x22   :  { %27 = dma.hbm_to_vmem [thread:$0]  %s1161_s1, 512, %s980_s24, [#allocation3], %s929_s9, %s929_s9, %s930_s10  }
  0x23   :  { %s931_s22 = smov [#allocation7]   ;;  %s877_s27 = scalar_lea.hbm %s1164_s4, 1024 }
  0x24   :  { %s47_s23 = sshll.u32 %s931_s22, 4  ;;  %p878_p2 = scmp.ne.s32.totalorder %s1164_s4, %s877_s27  ;;  %s48_s23 = int_to_ptr.vmem [resolvable:$true] %s47_s23 }
  0x25   :  { %p881_p3 = scmp.lt.u32.totalorder %s877_s27, %s1164_s4 }
  0x27   :  { %p883_p4 = pnand %p881_p3, %p878_p2 }
  0x29   :  { %886 = shalt.err (!%p883_p4)
}
  0x2a   :  { %s887_s8 = scalar_lea.vmem %s48_s23, 1024  ;;  %p892_p6 = scmp.lt.s32.totalorder %s48_s23, %s48_s23 }
  0x2b   :  { %p888_p5 = scmp.ne.s32.totalorder %s48_s23, %s887_s8  ;;  %p893_p7 = scmp.lt.s32.totalorder %s887_s8, %s887_s8 }
  0x2d   :  { %p894_p8 = por %p893_p7, %p892_p6 }
  0x2f   :  { %p895_p9 = pnand %p894_p8, %p888_p5 }
  0x31   :  { %898 = shalt.err (!%p895_p9)
}
  0x32   :  { %53 = dma.hbm_to_vmem [thread:$0]  %s1164_s4, 1024, %s48_s23, [#allocation6], %s929_s9, %s929_s9, %s930_s10  }
  0x33   :  { %921 = dma.done.wait [#allocation3], 512  }
  0x34   :  { %922 = vsyncadd [#allocation3], 4294966784 }
  0x35   :  { %923 = dma.done.wait [#allocation6], 2048  }
  0x36   :  { %924 = vsyncadd [#allocation6], 4294965248  ;;  %v932_v0 = vmov 1   ;;  %v933_v1 = vmov 0   ;;  %v934_v2 = vmov 0.0   ;;  %v66_v3 = vld [vmem:[%s1160_s0] sm:$0xff]  ;;  %v68_v27 = vlaneseq }
  0x37   :  { %801 = vset.pattern.permute.xlu1 %v932_v0  ;;  %800 = vset.pattern.permute.xlu0 %v933_v1  ;;  %v67_v4 = vld [vmem:[%s1160_s0 + $0x8] sm:$0xff]  ;;  %v935_v5 = vmov 2   ;;  %v936_v6 = vmov 3   ;;  %v937_v7 = vmov 4   ;;  %v938_v8 = vmov 5   ;;  %v813_v11 = vld [vmem:[#allocation2] sm:$0xff]  }
  0x38   :  { %690 = vmatprep.subr.bf16.mxu0 %v934_v2  ;;  %702 = vmatprep.subr.bf16.mxu1 %v934_v2  ;;  %v939_v9 = vmov 6   ;;  %v940_v10 = vmov 7   ;;  %v814_v12 = vld [vmem:[#allocation2 + $0x8] sm:$0xff]   ;;  %v815_v13 = vld [vmem:[#allocation2 + $0x10] sm:$0xff]   ;;  %v816_v14 = vld [vmem:[#allocation2 + $0x18] sm:$0xff]   ;;  %vm941_vm0 = vmmov 0  }
  0x39   :  { %85 = vperm.xlu1 %801, %v66_v3   ;;  %71 = vperm.xlu0 %800, %v66_v3   ;;  %v1048_v15 = vld [vmem:[#allocation5] sm:$0xff]   ;;  %v1051_v16 = vld [vmem:[#allocation5 + $0x8] sm:$0xff]   ;;  %v1055_v17 = vld [vmem:[#allocation5 + $0x10] sm:$0xff]   ;;  %v69_v30 = vand.u32 127, %v68_v27  ;;  %s942_s10 = smov [#allocation8]  }
  0x3a   :  { %691 = vmatpush3.bf16.msra.mxu0 %v813_v11  ;;  %698 = vmatprep.mubr.msk.bf16.mxu0 %vm941_vm0, %v934_v2  ;;  %v1059_v18 = vld [vmem:[#allocation5 + $0x18] sm:$0xff]   ;;  %v1063_v19 = vld [vmem:[#allocation5 + $0x20] sm:$0xff]   ;;  %v1067_v20 = vld [vmem:[#allocation5 + $0x28] sm:$0xff]   ;;  %s597_s15 = sshll.u32 %s942_s10, 4  ;;  %s598_s15 = int_to_ptr.vmem [resolvable:$true] %s597_s15 }
  0x3b   :  { %692 = vmatprep.subr.bf16.mxu0 %v934_v2  ;;  %718 = vmatprep.mubr.msk.bf16.mxu1 %vm941_vm0, %v934_v2  ;;  %s899_s16 = scalar_lea.vmem %s598_s15, 256  ;;  %p904_p11 = scmp.lt.s32.totalorder %s598_s15, %s598_s15 }
  0x3c   :  { %703 = vmatpush3.bf16.msra.mxu1 %v1048_v15  ;;  %p900_p10 = scmp.ne.s32.totalorder %s598_s15, %s899_s16  ;;  %p905_p12 = scmp.lt.s32.totalorder %s899_s16, %s899_s16 }
  0x3d   :  { %88 = vperm.xlu1 %801, %v67_v4   ;;  %74 = vperm.xlu0 %800, %v67_v4  }
  0x3e   :  { %693 = vmatpush3.bf16.msra.mxu0 %v814_v12  ;;  %704 = vmatprep.subr.bf16.mxu1 %v934_v2  ;;  %p906_p13 = por %p905_p12, %p904_p11 }
  0x3f   :  { %694 = vmatprep.subr.bf16.mxu0 %v934_v2 }
  0x40   :  { %705 = vmatpush3.bf16.msra.mxu1 %v1051_v16  ;;  %p907_p0 = pnand %p906_p13, %p900_p10 }
  0x41   :  { %803 = vset.pattern.permute.xlu1 %v935_v5  ;;  %802 = vset.pattern.permute.xlu0 %v935_v5 }
  0x42   :  { %102 = vperm.xlu1 %803, %v67_v4   ;;  %99 = vperm.xlu0 %802, %v66_v3  }
  0x43   :  { %695 = vmatpush3.bf16.msra.mxu0 %v815_v13  ;;  %706 = vmatprep.subr.bf16.mxu1 %v934_v2 }
  0x44   :  { %696 = vmatprep.subr.bf16.mxu0 %v934_v2  ;;  %707 = vmatpush3.bf16.msra.mxu1 %v1055_v17 }
  0x45   :  { %708 = vmatprep.subr.bf16.mxu1 %v934_v2 }
  0x46   :  { %804 = vset.pattern.permute.xlu1 %v936_v6  ;;  %805 = vset.pattern.permute.xlu0 %v936_v6 }
  0x47   :  { %113 = vperm.xlu1 %804, %v66_v3   ;;  %116 = vperm.xlu0 %805, %v67_v4  }
  0x48   :  { %697 = vmatpush3.bf16.msra.mxu0 %v816_v14  ;;  %709 = vmatpush3.bf16.msra.mxu1 %v1059_v18 }
  0x49   :  { %722 = vmatprep.subr.bf16.mxu0 %v934_v2  ;;  %710 = vmatprep.subr.bf16.mxu1 %v934_v2 }
  0x4b   :  { %806 = vset.pattern.permute.xlu1 %v937_v7  ;;  %807 = vset.pattern.permute.xlu0 %v938_v8  ;;  %v823_v7 = vld [vmem:[#allocation5 + $0x30] sm:$0xff]  }
  0x4c   :  { %127 = vperm.xlu1 %806, %v66_v3   ;;  %141 = vperm.xlu0 %807, %v66_v3  }
  0x4d   :  { %711 = vmatpush3.bf16.msra.mxu1 %v1063_v19 }
  0x4e   :  { %712 = vmatprep.subr.bf16.mxu1 %v934_v2 }
  0x50   :  { %130 = vperm.xlu1 %806, %v67_v4   ;;  %810 = vset.pattern.permute.xlu0 %v939_v9 }
  0x51   :  { %158 = vperm.xlu0 %810, %v67_v4   ;;  %713 = vmatpush3.bf16.msra.mxu1 %v1067_v20 }
  0x52   :  { %714 = vmatprep.subr.bf16.mxu1 %v934_v2 }
  0x54   :  { %808 = vset.pattern.permute.xlu1 %v938_v8  ;;  %v824_v8 = vld [vmem:[#allocation5 + $0x38] sm:$0xff]  }
  0x55   :  { %144 = vperm.xlu1 %808, %v67_v4   ;;  %812 = vset.pattern.permute.xlu0 %v940_v10 }
  0x56   :  { %715 = vmatpush3.bf16.msra.mxu1 %v823_v7 }
  0x57   :  { %716 = vmatprep.subr.bf16.mxu1 %v934_v2 }
  0x59   :  { %809 = vset.pattern.permute.xlu1 %v939_v9 }
  0x5a   :  { %155 = vperm.xlu1 %809, %v66_v3   ;;  %717 = vmatpush3.bf16.msra.mxu1 %v824_v8 }
  0x5b   :  { %742 = vmatprep.subr.bf16.mxu1 %v934_v2 }
  0x5e   :  { %811 = vset.pattern.permute.xlu1 %v940_v10 }
  0x5f   :  { %169 = vperm.xlu1 %811, %v66_v3  }
  0x63   :  { %172 = vperm.xlu1 %811, %v67_v4  }
  0xb8   :  { %v86_v21 = vpop.permute.xlu1 %85  ;;  %v72_v23 = vpop.permute.xlu0 %71 }
  0xb9   :  { %vm90_vm1 = vcmp.eq.s32.totalorder %v69_v30, %v86_v21  ;;  %vm76_vm2 = vcmp.eq.s32.totalorder %v69_v30, %v72_v23 }
  0xba   :  { %v612_v33 = vsel %vm90_vm1, 1.0, %v934_v2  ;;  %v610_v34 = vsel %vm76_vm2, 1.0, %v934_v2  ;;  %vm215_vm2 = vcmask 523264  }
  0xbb   :  { %v96_v41 = vadd.f32 %v612_v33, %v610_v34  ;;  %v828_v33 = vld [vmem:[#allocation7 + $0x18] sm:$0xff]   ;;  %v829_v34 = vld [vmem:[#allocation7 + $0x20] sm:$0xff]  }
  0xbc   :  { %v89_v22 = vpop.permute.xlu1 %88  ;;  %v75_v25 = vpop.permute.xlu0 %74 }
  0xbd   :  { %vm91_vm3 = vcmp.eq.s32.totalorder %v69_v30, %v89_v22  ;;  %vm77_vm4 = vcmp.eq.s32.totalorder %v69_v30, %v75_v25 }
  0xbe   :  { %v613_v35 = vsel %vm91_vm3, 1.0, %v934_v2  ;;  %v611_v36 = vsel %vm77_vm4, 1.0, %v934_v2 }
  0xbf   :  { %v97_v42 = vadd.f32 %v613_v35, %v611_v36 }
  0xc1   :  { %v103_v24 = vpop.permute.xlu1 %102  ;;  %v100_v29 = vpop.permute.xlu0 %99 }
  0xc2   :  { %vm105_vm5 = vcmp.eq.s32.totalorder %v69_v30, %v103_v24  ;;  %vm104_vm6 = vcmp.eq.s32.totalorder %v69_v30, %v100_v29 }
  0xc3   :  { %v615_v38 = vsel %vm105_vm5, 1.0, %v934_v2  ;;  %v614_v39 = vsel %vm104_vm6, 1.0, %v934_v2 }
  0xc4   :  { %v111_v45 = vadd.f32 %v615_v38, %v97_v42  ;;  %v110_v46 = vadd.f32 %v614_v39, %v96_v41 }
  0xc6   :  { %v114_v26 = vpop.permute.xlu1 %113  ;;  %v117_v32 = vpop.permute.xlu0 %116 }
  0xc7   :  { %vm118_vm7 = vcmp.eq.s32.totalorder %v69_v30, %v114_v26  ;;  %vm119_vm8 = vcmp.eq.s32.totalorder %v69_v30, %v117_v32  ;;  %v827_v32 = vld [vmem:[#allocation7 + $0x10] sm:$0xff]  }
  0xc8   :  { %v616_v43 = vsel %vm118_vm7, 1.0, %v934_v2  ;;  %v617_v44 = vsel %vm119_vm8, 1.0, %v934_v2 }
  0xc9   :  { %v124_v51 = vadd.f32 %v616_v43, %v110_v46  ;;  %v125_v52 = vadd.f32 %v617_v44, %v111_v45 }
  0xcb   :  { %v128_v28 = vpop.permute.xlu1 %127  ;;  %v142_v40 = vpop.permute.xlu0 %141 }
  0xcc   :  { %vm132_vm9 = vcmp.eq.s32.totalorder %v69_v30, %v128_v28  ;;  %vm146_vm12 = vcmp.eq.s32.totalorder %v69_v30, %v142_v40 }
  0xcd   :  { %v618_v48 = vsel %vm132_vm9, 1.0, %v934_v2  ;;  %v620_v56 = vsel %vm146_vm12, 1.0, %v934_v2 }
  0xce   :  { %v138_v54 = vadd.f32 %v618_v48, %v124_v51  ;;  %v830_v48 = vld [vmem:[#allocation7 + $0x28] sm:$0xff]  }
  0xcf   :  { %v131_v31 = vpop.permute.xlu1 %130 }
  0xd0   :  { %vm133_vm10 = vcmp.eq.s32.totalorder %v69_v30, %v131_v31  ;;  %v159_v50 = vpop.permute.xlu0 %158  ;;  %v152_v61 = vadd.f32 %v620_v56, %v138_v54  ;;  %v826_v31 = vld [vmem:[#allocation7 + $0x8] sm:$0xff]  }
  0xd1   :  { %v619_v49 = vsel %vm133_vm10, 1.0, %v934_v2  ;;  %vm161_vm13 = vcmp.eq.s32.totalorder %v69_v30, %v159_v50  ;;  %v832_v50 = vld [vmem:[#allocation7 + $0x38] sm:$0xff]  }
  0xd2   :  { %v139_v55 = vadd.f32 %v619_v49, %v125_v52  ;;  %v623_v59 = vsel %vm161_vm13, 1.0, %v934_v2  ;;  %v831_v49 = vld [vmem:[#allocation7 + $0x30] sm:$0xff]  }
  0xd4   :  { %v145_v37 = vpop.permute.xlu1 %144 }
  0xd5   :  { %vm147_vm11 = vcmp.eq.s32.totalorder %v69_v30, %v145_v37 }
  0xd6   :  { %v621_v53 = vsel %vm147_vm11, 1.0, %v934_v2 }
  0xd7   :  { %v153_v58 = vadd.f32 %v621_v53, %v139_v55 }
  0xd9   :  { %v156_v47 = vpop.permute.xlu1 %155  ;;  %v167_v0 = vadd.f32 %v623_v59, %v153_v58 }
  0xda   :  { %vm160_vm14 = vcmp.eq.s32.totalorder %v69_v30, %v156_v47 }
  0xdb   :  { %v622_v60 = vsel %vm160_vm14, 1.0, %v934_v2 }
  0xdc   :  { %v166_v1 = vadd.f32 %v622_v60, %v152_v61 }
  0xde   :  { %v170_v57 = vpop.permute.xlu1 %169 }
  0xdf   :  { %vm174_vm15 = vcmp.eq.s32.totalorder %v69_v30, %v170_v57 }
  0xe0   :  { %v624_v62 = vsel %vm174_vm15, 1.0, %v934_v2 }
  0xe1   :  { %v180_v4 = vadd.f32 %v624_v62, %v166_v1 }
  0xe2   :  { %v173_v63 = vpop.permute.xlu1 %172 }
  0xe3   :  { %vm175_vm1 = vcmp.eq.s32.totalorder %v69_v30, %v173_v63  ;;  %v825_v30 = vld [vmem:[#allocation7] sm:$0xff]  }
  0xe4   :  { %v625_v3 = vsel %vm175_vm1, 1.0, %v934_v2 }
  0xe5   :  { %v181_v5 = vadd.f32 %v625_v3, %v167_v0 }
  0xe7   :  { %v182_v6 = vpack.c.bf16 %v181_v5, %v180_v4 }
  0xe9   :  { %699 = vmatmul.mubr.msk.bf16.vlgmr.msra.gmra.mrb[0].mxu0 %vm215_vm2, %v182_v6 }
  0xea   :  { %723 = vmatpush3.bf16.msra.mxu0 %v1048_v15  ;;  %738 = vmatprep.mubr.msk.bf16.mxu0 %vm941_vm0, %v934_v2 }
  0xeb   :  { %724 = vmatprep.subr.bf16.mxu0 %v934_v2 }
  0xee   :  { %725 = vmatpush3.bf16.msra.mxu0 %v1051_v16 }
  0xef   :  { %726 = vmatprep.subr.bf16.mxu0 %v934_v2 }
  0xf2   :  { %727 = vmatpush3.bf16.msra.mxu0 %v1055_v17 }
  0xf3   :  { %728 = vmatprep.subr.bf16.mxu0 %v934_v2 }
  0xf6   :  { %729 = vmatpush3.bf16.msra.mxu0 %v1059_v18 }
  0xf7   :  { %730 = vmatprep.subr.bf16.mxu0 %v934_v2 }
  0xfa   :  { %731 = vmatpush3.bf16.msra.mxu0 %v1063_v19 }
  0xfb   :  { %732 = vmatprep.subr.bf16.mxu0 %v934_v2 }
  0xfe   :  { %733 = vmatpush3.bf16.msra.mxu0 %v1067_v20 }
  0xff   :  { %734 = vmatprep.subr.bf16.mxu0 %v934_v2 }
 0x102   :  { %735 = vmatpush3.bf16.msra.mxu0 %v823_v7 }
 0x103   :  { %736 = vmatprep.subr.bf16.mxu0 %v934_v2 }
 0x106   :  { %737 = vmatpush3.bf16.msra.mxu0 %v824_v8 }
 0x107   :  { %762 = vmatprep.subr.bf16.mxu0 %v934_v2 }
 0x1bc   :  { %v253_v9 = vpop.f32.mrb[0].mxu0 }
 0x1bd   :  { %v700_v10 = vpop.f32.mrb[1].mxu0  ;;  %v1106_v12 = vmul.f32 0.125, %v253_v9 }
 0x1be   :  { %v256_v11 = vpop.f32.mrb[2].mxu0 }
 0x1bf   :  { %v1108_v13 = vmul.f32 0.125, %v256_v11  ;;  %v701_v14 = vpop.f32.mrb[3].mxu0 }
 0x1c1   :  { %v285_v21 = vpack.c.bf16 %v1108_v13, %v1106_v12 }
 0x1c3   :  { %719 = vmatmul.mubr.bf16.vlgmr.msra.gmra.mrb[0].mxu1 %v285_v21 }
 0x1c4   :  { %743 = vmatpush3.bf16.msra.mxu1 %v1048_v15  ;;  %758 = vmatprep.mubr.msk.bf16.mxu1 %vm941_vm0, %v934_v2  ;;  %v631_v15 = vld [vmem:[%s1163_s3] ss:$0 sm:$0xff] }
 0x1c5   :  { %744 = vmatprep.subr.bf16.mxu1 %v934_v2 }
 0x1c8   :  { %745 = vmatpush3.bf16.msra.mxu1 %v1051_v16 }
 0x1c9   :  { %746 = vmatprep.subr.bf16.mxu1 %v934_v2 }
 0x1cc   :  { %747 = vmatpush3.bf16.msra.mxu1 %v1055_v17 }
 0x1cd   :  { %748 = vmatprep.subr.bf16.mxu1 %v934_v2 }
 0x1d0   :  { %749 = vmatpush3.bf16.msra.mxu1 %v1059_v18 }
 0x1d1   :  { %750 = vmatprep.subr.bf16.mxu1 %v934_v2 }
 0x1d4   :  { %751 = vmatpush3.bf16.msra.mxu1 %v1063_v19 }
 0x1d5   :  { %752 = vmatprep.subr.bf16.mxu1 %v934_v2 }
 0x1d8   :  { %753 = vmatpush3.bf16.msra.mxu1 %v1067_v20 }
 0x1d9   :  { %754 = vmatprep.subr.bf16.mxu1 %v934_v2 }
 0x1dc   :  { %755 = vmatpush3.bf16.msra.mxu1 %v823_v7 }
 0x1dd   :  { %756 = vmatprep.subr.bf16.mxu1 %v934_v2 }
 0x1e0   :  { %757 = vmatpush3.bf16.msra.mxu1 %v824_v8 }
 0x296   :  { %v368_v16 = vpop.f32.mrb[0].mxu1 }
 0x297   :  { %v369_v17 = vadd.f32 %v631_v15, %v368_v16  ;;  %v720_v18 = vpop.f32.mrb[1].mxu1 }
 0x298   :  { %v371_v22 = vpop.f32.mrb[2].mxu1 }
 0x299   :  { %v375_v23 = vmax.f32 %v369_v17, 0.0  ;;  %v372_v19 = vadd.f32 %v631_v15, %v371_v22  ;;  %v721_v24 = vpop.f32.mrb[3].mxu1 }
 0x29b   :  { %v377_v25 = vadd.f32 %v375_v23, %v1106_v12  ;;  %v376_v20 = vmax.f32 %v372_v19, 0.0 }
 0x29d   :  { %v378_v26 = vadd.f32 %v376_v20, %v1108_v13  ;;  %v379_v27 = vmax.f32 %v377_v25, 0.0 }
 0x29f   :  { %v380_v28 = vmax.f32 %v378_v26, 0.0 }
 0x2a1   :  { %v381_v29 = vpack.c.bf16 %v380_v28, %v379_v27 }
 0x2a3   :  { %739 = vmatmul.mubr.bf16.vlgmr.msra.gmra.mrb[4].mxu0 %v381_v29 }
 0x2a4   :  { %778 = vmatprep.mubr.msk.bf16.mxu0 %vm941_vm0, %v934_v2  ;;  %763 = vmatpush3.bf16.msra.mxu0 %v825_v30 }
 0x2a5   :  { %764 = vmatprep.subr.bf16.mxu0 %v934_v2 }
 0x2a8   :  { %765 = vmatpush3.bf16.msra.mxu0 %v826_v31 }
 0x2a9   :  { %766 = vmatprep.subr.bf16.mxu0 %v934_v2 }
 0x2ac   :  { %767 = vmatpush3.bf16.msra.mxu0 %v827_v32 }
 0x2ad   :  { %768 = vmatprep.subr.bf16.mxu0 %v934_v2 }
 0x2b0   :  { %769 = vmatpush3.bf16.msra.mxu0 %v828_v33 }
 0x2b1   :  { %770 = vmatprep.subr.bf16.mxu0 %v934_v2 }
 0x2b4   :  { %771 = vmatpush3.bf16.msra.mxu0 %v829_v34 }
 0x2b5   :  { %772 = vmatprep.subr.bf16.mxu0 %v934_v2 }
 0x2b8   :  { %773 = vmatpush3.bf16.msra.mxu0 %v830_v48 }
 0x2b9   :  { %774 = vmatprep.subr.bf16.mxu0 %v934_v2 }
 0x2bc   :  { %775 = vmatpush3.bf16.msra.mxu0 %v831_v49 }
 0x2bd   :  { %776 = vmatprep.subr.bf16.mxu0 %v934_v2  ;;  %v640_v2 = vld [vmem:[%s1165_s5] ss:$0 sm:$0xff] }
 0x2c0   :  { %777 = vmatpush3.bf16.msra.mxu0 %v832_v50 }
 0x376   :  { %v416_v35 = vpop.f32.mrb[4].mxu0 }
 0x377   :  { %v417_v36 = vadd.f32 %v631_v15, %v416_v35  ;;  %v740_v37 = vpop.f32.mrb[5].mxu0 }
 0x378   :  { %v419_v38 = vpop.f32.mrb[6].mxu0 }
 0x379   :  { %v423_v39 = vmax.f32 %v417_v36, 0.0  ;;  %v420_v40 = vadd.f32 %v631_v15, %v419_v38  ;;  %v741_v41 = vpop.f32.mrb[7].mxu0 }
 0x37b   :  { %v425_v42 = vadd.f32 %v423_v39, %v1106_v12  ;;  %v424_v43 = vmax.f32 %v420_v40, 0.0 }
 0x37d   :  { %v426_v44 = vadd.f32 %v424_v43, %v1108_v13  ;;  %v427_v45 = vmax.f32 %v425_v42, 0.0 }
 0x37f   :  { %v428_v46 = vmax.f32 %v426_v44, 0.0 }
 0x381   :  { %v429_v47 = vpack.c.bf16 %v428_v46, %v427_v45 }
 0x383   :  { %759 = vmatmul.mubr.bf16.vlgmr.msra.gmra.mrb[4].mxu1 %v429_v47 }
 0x456   :  { %v464_v51 = vpop.f32.mrb[4].mxu1 }
 0x457   :  { %v465_v52 = vadd.f32 %v631_v15, %v464_v51  ;;  %v760_v53 = vpop.f32.mrb[5].mxu1 }
 0x458   :  { %v467_v54 = vpop.f32.mrb[6].mxu1 }
 0x459   :  { %v471_v55 = vmax.f32 %v465_v52, 0.0  ;;  %v468_v56 = vadd.f32 %v631_v15, %v467_v54  ;;  %v761_v57 = vpop.f32.mrb[7].mxu1 }
 0x45b   :  { %v473_v58 = vadd.f32 %v471_v55, %v1106_v12  ;;  %v472_v59 = vmax.f32 %v468_v56, 0.0 }
 0x45d   :  { %v474_v60 = vadd.f32 %v472_v59, %v1108_v13  ;;  %v475_v61 = vmax.f32 %v473_v58, 0.0 }
 0x45f   :  { %v476_v62 = vmax.f32 %v474_v60, 0.0 }
 0x461   :  { %v477_v63 = vpack.c.bf16 %v476_v62, %v475_v61 }
 0x463   :  { %779 = vmatmul.mubr.bf16.vlgmr.msra.gmra.mrb[8].mxu0 %v477_v63 }
 0x536   :  { %v583_v0 = vpop.f32.mrb[8].mxu0 }
 0x537   :  { %v584_v1 = vadd.f32 %v640_v2, %v583_v0  ;;  %v780_v3 = vpop.f32.mrb[9].mxu0 }
 0x538   :  { %v586_v4 = vpop.f32.mrb[10].mxu0 }
 0x539   :  { %590 = vst [vmem:[#allocation8] sm:$0xff] %v584_v1  ;;  %v587_v5 = vadd.f32 %v640_v2, %v586_v4  ;;  %v781_v6 = vpop.f32.mrb[11].mxu0 }
 0x53b   :  { %591 = vst [vmem:[#allocation8 + $0x8] sm:$0xff] %v587_v5 }
 0x53c   :  { %910 = shalt.err (!%p907_p0)
}
 0x53d   :  { %s911_s18 = scalar_lea.hbm %s1166_s6, 256 }
 0x53e   :  { %p912_p1 = scmp.ne.s32.totalorder %s1166_s6, %s911_s18  ;;  %p915_p2 = scmp.lt.u32.totalorder %s911_s18, %s1166_s6 }
 0x540   :  { %p917_p3 = pnand %p915_p2, %p912_p1 }
 0x542   :  { %920 = shalt.err (!%p917_p3)
}
 0x543   :  { %s943_s22 = smov 128   ;;  %s944_s23 = smov 8  }
 0x544   :  { %603 = dma.vmem_to_hbm [thread:$0]  %s598_s15, 256, %s1166_s6, [#allocation4], %s943_s22, %s943_s22, %s944_s23  }
 0x545   :  { %925 = dma.done.wait [#allocation4], 256  }
 0x546   :  { %926 = vsyncadd [#allocation4], 4294967040 }
 0x547   :  { %607 = vsyncpa [#allocation3], 1 }
 0x548   :  { %608 = vsyncpa [#allocation6], 1 }
 0x549   :  { %609 = vsyncpa [#allocation4], 1 }

// kernel: tpu_custom_call.1
= control target key start
LH: loop header
LB: loop body
LE: loop exit
PB: predicated region body
PF: predicated region fallthrough
CT: control target
= control target key end

     0   :  { %11 = vsyncpa [#allocation3], 0  ;;  %s1160_s0 = inlined_call_operand.vmem [shape: s32[16,8], index: 0, kind: input, shape index: {}]   ;;  %s1161_s1 = inlined_call_operand.hbm [shape: bf16[64,128], index: 1, kind: input, shape index: {}]   ;;  %s1162_s2 = inlined_call_operand.hbm [shape: bf16[128,128], index: 2, kind: input, shape index: {}]   ;;  %s1163_s3 = inlined_call_operand.vmem [shape: f32[1,128], index: 3, kind: input, shape index: {}]   ;;  %s1164_s4 = inlined_call_operand.hbm [shape: bf16[128,128], index: 4, kind: input, shape index: {}]   ;;  %s1165_s5 = inlined_call_operand.vmem [shape: f32[1,128], index: 5, kind: input, shape index: {}]   ;;  %s1166_s6 = inlined_call_operand.hbm [shape: f32[16,128], index: 6, kind: output, shape index: {}]  }
   0x1   :  { %12 = vsyncpa [#allocation6], 0 }
   0x2   :  { %13 = vsyncpa [#allocation4], 0  ;;  %s927_s21 = smov [#allocation5]   ;;  %s928_s23 = smov [#allocation2]  }
   0x3   :  { %s33_s22 = sshll.u32 %s927_s21, 4  ;;  %s21_s24 = sshll.u32 %s928_s23, 4  ;;  %s34_s22 = int_to_ptr.vmem [resolvable:$true] %s33_s22  ;;  %s980_s24 = int_to_ptr.vmem [resolvable:$true] %s21_s24 }
   0x4   :  { %s833_s27 = scalar_lea.hbm %s1162_s2, 1024 }
   0x5   :  { %p834_p0 = scmp.ne.s32.totalorder %s1162_s2, %s833_s27  ;;  %p837_p1 = scmp.lt.u32.totalorder %s833_s27, %s1162_s2 }
   0x7   :  { %p839_p2 = pnand %p837_p1, %p834_p0 }
   0x9   :  { %842 = shalt.err (!%p839_p2)
}
   0xa   :  { %s843_s8 = scalar_lea.vmem %s34_s22, 1024  ;;  %p848_p4 = scmp.lt.s32.totalorder %s34_s22, %s34_s22 }
   0xb   :  { %p844_p3 = scmp.ne.s32.totalorder %s34_s22, %s843_s8  ;;  %p849_p5 = scmp.lt.s32.totalorder %s843_s8, %s843_s8 }
   0xd   :  { %p850_p6 = por %p849_p5, %p848_p4 }
   0xf   :  { %p851_p7 = pnand %p850_p6, %p844_p3 }
  0x11   :  { %854 = shalt.err (!%p851_p7)
}
  0x12   :  { %s929_s9 = smov 64   ;;  %s930_s10 = smov 4  }
  0x13   :  { %39 = dma.hbm_to_vmem [thread:$0]  %s1162_s2, 1024, %s34_s22, [#allocation6], %s929_s9, %s929_s9, %s930_s10  }
  0x14   :  { %s855_s15 = scalar_lea.hbm %s1161_s1, 512 }
  0x15   :  { %p856_p8 = scmp.ne.s32.totalorder %s1161_s1, %s855_s15  ;;  %p859_p9 = scmp.lt.u32.totalorder %s855_s15, %s1161_s1 }
  0x17   :  { %p861_p10 = pnand %p859_p9, %p856_p8 }
  0x19   :  { %864 = shalt.err (!%p861_p10)
}
  0x1a   :  { %s865_s20 = scalar_lea.vmem %s980_s24, 512  ;;  %p870_p12 = scmp.lt.s32.totalorder %s980_s24, %s980_s24 }
  0x1b   :  { %p866_p11 = scmp.ne.s32.totalorder %s980_s24, %s865_s20  ;;  %p871_p13 = scmp.lt.s32.totalorder %s865_s20, %s865_s20 }
  0x1d   :  { %p872_p0 = por %p871_p13, %p870_p12 }
  0x1f   :  { %p873_p1 = pnand %p872_p0, %p866_p11 }
  0x21   :  { %876 = shalt.err (!%p873_p1)
}
  0x22   :  { %27 = dma.hbm_to_vmem [thread:$0]  %s1161_s1, 512, %s980_s24, [#allocation3], %s929_s9, %s929_s9, %s930_s10  }
  0x23   :  { %s931_s22 = smov [#allocation7]   ;;  %s877_s27 = scalar_lea.hbm %s1164_s4, 1024 }
  0x24   :  { %s47_s23 = sshll.u32 %s931_s22, 4  ;;  %p878_p2 = scmp.ne.s32.totalorder %s1164_s4, %s877_s27  ;;  %s48_s23 = int_to_ptr.vmem [resolvable:$true] %s47_s23 }
  0x25   :  { %p881_p3 = scmp.lt.u32.totalorder %s877_s27, %s1164_s4 }
  0x27   :  { %p883_p4 = pnand %p881_p3, %p878_p2 }
  0x29   :  { %886 = shalt.err (!%p883_p4)
}
  0x2a   :  { %s887_s8 = scalar_lea.vmem %s48_s23, 1024  ;;  %p892_p6 = scmp.lt.s32.totalorder %s48_s23, %s48_s23 }
  0x2b   :  { %p888_p5 = scmp.ne.s32.totalorder %s48_s23, %s887_s8  ;;  %p893_p7 = scmp.lt.s32.totalorder %s887_s8, %s887_s8 }
  0x2d   :  { %p894_p8 = por %p893_p7, %p892_p6 }
  0x2f   :  { %p895_p9 = pnand %p894_p8, %p888_p5 }
  0x31   :  { %898 = shalt.err (!%p895_p9)
}
  0x32   :  { %53 = dma.hbm_to_vmem [thread:$0]  %s1164_s4, 1024, %s48_s23, [#allocation6], %s929_s9, %s929_s9, %s930_s10  }
  0x33   :  { %921 = dma.done.wait [#allocation3], 512  }
  0x34   :  { %922 = vsyncadd [#allocation3], 4294966784 }
  0x35   :  { %923 = dma.done.wait [#allocation6], 2048  }
  0x36   :  { %924 = vsyncadd [#allocation6], 4294965248  ;;  %v932_v0 = vmov 1   ;;  %v933_v1 = vmov 0   ;;  %v934_v2 = vmov 0.0   ;;  %v66_v3 = vld [vmem:[%s1160_s0] sm:$0xff]  ;;  %v68_v27 = vlaneseq }
  0x37   :  { %801 = vset.pattern.permute.xlu1 %v932_v0  ;;  %800 = vset.pattern.permute.xlu0 %v933_v1  ;;  %v67_v4 = vld [vmem:[%s1160_s0 + $0x8] sm:$0xff]  ;;  %v935_v5 = vmov 2   ;;  %v936_v6 = vmov 3   ;;  %v937_v7 = vmov 4   ;;  %v938_v8 = vmov 5   ;;  %v813_v11 = vld [vmem:[#allocation2] sm:$0xff]  }
  0x38   :  { %690 = vmatprep.subr.bf16.mxu0 %v934_v2  ;;  %702 = vmatprep.subr.bf16.mxu1 %v934_v2  ;;  %v939_v9 = vmov 6   ;;  %v940_v10 = vmov 7   ;;  %v814_v12 = vld [vmem:[#allocation2 + $0x8] sm:$0xff]   ;;  %v815_v13 = vld [vmem:[#allocation2 + $0x10] sm:$0xff]   ;;  %v816_v14 = vld [vmem:[#allocation2 + $0x18] sm:$0xff]   ;;  %vm941_vm0 = vmmov 0  }
  0x39   :  { %85 = vperm.xlu1 %801, %v66_v3   ;;  %71 = vperm.xlu0 %800, %v66_v3   ;;  %v1048_v15 = vld [vmem:[#allocation5] sm:$0xff]   ;;  %v1051_v16 = vld [vmem:[#allocation5 + $0x8] sm:$0xff]   ;;  %v1055_v17 = vld [vmem:[#allocation5 + $0x10] sm:$0xff]   ;;  %v69_v30 = vand.u32 127, %v68_v27  ;;  %s942_s10 = smov [#allocation8]  }
  0x3a   :  { %691 = vmatpush3.bf16.msra.mxu0 %v813_v11  ;;  %698 = vmatprep.mubr.msk.bf16.mxu0 %vm941_vm0, %v934_v2  ;;  %v1059_v18 = vld [vmem:[#allocation5 + $0x18] sm:$0xff]   ;;  %v1063_v19 = vld [vmem:[#allocation5 + $0x20] sm:$0xff]   ;;  %v1067_v20 = vld [vmem:[#allocation5 + $0x28] sm:$0xff]   ;;  %s597_s15 = sshll.u32 %s942_s10, 4  ;;  %s598_s15 = int_to_ptr.vmem [resolvable:$true] %s597_s15 }
  0x3b   :  { %692 = vmatprep.subr.bf16.mxu0 %v934_v2  ;;  %718 = vmatprep.mubr.msk.bf16.mxu1 %vm941_vm0, %v934_v2  ;;  %s899_s16 = scalar_lea.vmem %s598_s15, 256  ;;  %p904_p11 = scmp.lt.s32.totalorder %s598_s15, %s598_s15 }
  0x3c   :  { %703 = vmatpush3.bf16.msra.mxu1 %v1048_v15  ;;  %p900_p10 = scmp.ne.s32.totalorder %s598_s15, %s899_s16  ;;  %p905_p12 = scmp.lt.s32.totalorder %s899_s16, %s899_s16 }
  0x3d   :  { %88 = vperm.xlu1 %801, %v67_v4   ;;  %74 = vperm.xlu0 %800, %v67_v4  }
  0x3e   :  { %693 = vmatpush3.bf16.msra.mxu0 %v814_v12  ;;  %704 = vmatprep.subr.bf16.mxu1 %v934_v2  ;;  %p906_p13 = por %p905_p12, %p904_p11 }
  0x3f   :  { %694 = vmatprep.subr.bf16.mxu0 %v934_v2 }
  0x40   :  { %705 = vmatpush3.bf16.msra.mxu1 %v1051_v16  ;;  %p907_p0 = pnand %p906_p13, %p900_p10 }
  0x41   :  { %803 = vset.pattern.permute.xlu1 %v935_v5  ;;  %802 = vset.pattern.permute.xlu0 %v935_v5 }
  0x42   :  { %102 = vperm.xlu1 %803, %v67_v4   ;;  %99 = vperm.xlu0 %802, %v66_v3  }
  0x43   :  { %695 = vmatpush3.bf16.msra.mxu0 %v815_v13  ;;  %706 = vmatprep.subr.bf16.mxu1 %v934_v2 }
  0x44   :  { %696 = vmatprep.subr.bf16.mxu0 %v934_v2  ;;  %707 = vmatpush3.bf16.msra.mxu1 %v1055_v17 }
  0x45   :  { %708 = vmatprep.subr.bf16.mxu1 %v934_v2 }
  0x46   :  { %804 = vset.pattern.permute.xlu1 %v936_v6  ;;  %805 = vset.pattern.permute.xlu0 %v936_v6 }
  0x47   :  { %113 = vperm.xlu1 %804, %v66_v3   ;;  %116 = vperm.xlu0 %805, %v67_v4  }
  0x48   :  { %697 = vmatpush3.bf16.msra.mxu0 %v816_v14  ;;  %709 = vmatpush3.bf16.msra.mxu1 %v1059_v18 }
  0x49   :  { %722 = vmatprep.subr.bf16.mxu0 %v934_v2  ;;  %710 = vmatprep.subr.bf16.mxu1 %v934_v2 }
  0x4b   :  { %806 = vset.pattern.permute.xlu1 %v937_v7  ;;  %807 = vset.pattern.permute.xlu0 %v938_v8  ;;  %v823_v7 = vld [vmem:[#allocation5 + $0x30] sm:$0xff]  }
  0x4c   :  { %127 = vperm.xlu1 %806, %v66_v3   ;;  %141 = vperm.xlu0 %807, %v66_v3  }
  0x4d   :  { %711 = vmatpush3.bf16.msra.mxu1 %v1063_v19 }
  0x4e   :  { %712 = vmatprep.subr.bf16.mxu1 %v934_v2 }
  0x50   :  { %130 = vperm.xlu1 %806, %v67_v4   ;;  %810 = vset.pattern.permute.xlu0 %v939_v9 }
  0x51   :  { %158 = vperm.xlu0 %810, %v67_v4   ;;  %713 = vmatpush3.bf16.msra.mxu1 %v1067_v20 }
  0x52   :  { %714 = vmatprep.subr.bf16.mxu1 %v934_v2 }
  0x54   :  { %808 = vset.pattern.permute.xlu1 %v938_v8  ;;  %v824_v8 = vld [vmem:[#allocation5 + $0x38] sm:$0xff]  }
  0x55   :  { %144 = vperm.xlu1 %808, %v67_v4   ;;  %812 = vset.pattern.permute.xlu0 %v940_v10 }
  0x56   :  { %715 = vmatpush3.bf16.msra.mxu1 %v823_v7 }
  0x57   :  { %716 = vmatprep.subr.bf16.mxu1 %v934_v2 }
  0x59   :  { %809 = vset.pattern.permute.xlu1 %v939_v9 }
  0x5a   :  { %155 = vperm.xlu1 %809, %v66_v3   ;;  %717 = vmatpush3.bf16.msra.mxu1 %v824_v8 }
  0x5b   :  { %742 = vmatprep.subr.bf16.mxu1 %v934_v2 }
  0x5e   :  { %811 = vset.pattern.permute.xlu1 %v940_v10 }
  0x5f   :  { %169 = vperm.xlu1 %811, %v66_v3  }
  0x63   :  { %172 = vperm.xlu1 %811, %v67_v4  }
  0xb8   :  { %v86_v21 = vpop.permute.xlu1 %85  ;;  %v72_v23 = vpop.permute.xlu0 %71 }
  0xb9   :  { %vm90_vm1 = vcmp.eq.s32.totalorder %v69_v30, %v86_v21  ;;  %vm76_vm2 = vcmp.eq.s32.totalorder %v69_v30, %v72_v23 }
  0xba   :  { %v612_v33 = vsel %vm90_vm1, 1.0, %v934_v2  ;;  %v610_v34 = vsel %vm76_vm2, 1.0, %v934_v2  ;;  %vm215_vm2 = vcmask 523264  }
  0xbb   :  { %v96_v41 = vadd.f32 %v612_v33, %v610_v34  ;;  %v828_v33 = vld [vmem:[#allocation7 + $0x18] sm:$0xff]   ;;  %v829_v34 = vld [vmem:[#allocation7 + $0x20] sm:$0xff]  }
  0xbc   :  { %v89_v22 = vpop.permute.xlu1 %88  ;;  %v75_v25 = vpop.permute.xlu0 %74 }
  0xbd   :  { %vm91_vm3 = vcmp.eq.s32.totalorder %v69_v30, %v89_v22  ;;  %vm77_vm4 = vcmp.eq.s32.totalorder %v69_v30, %v75_v25 }
  0xbe   :  { %v613_v35 = vsel %vm91_vm3, 1.0, %v934_v2  ;;  %v611_v36 = vsel %vm77_vm4, 1.0, %v934_v2 }
  0xbf   :  { %v97_v42 = vadd.f32 %v613_v35, %v611_v36 }
  0xc1   :  { %v103_v24 = vpop.permute.xlu1 %102  ;;  %v100_v29 = vpop.permute.xlu0 %99 }
  0xc2   :  { %vm105_vm5 = vcmp.eq.s32.totalorder %v69_v30, %v103_v24  ;;  %vm104_vm6 = vcmp.eq.s32.totalorder %v69_v30, %v100_v29 }
  0xc3   :  { %v615_v38 = vsel %vm105_vm5, 1.0, %v934_v2  ;;  %v614_v39 = vsel %vm104_vm6, 1.0, %v934_v2 }
  0xc4   :  { %v111_v45 = vadd.f32 %v615_v38, %v97_v42  ;;  %v110_v46 = vadd.f32 %v614_v39, %v96_v41 }
  0xc6   :  { %v114_v26 = vpop.permute.xlu1 %113  ;;  %v117_v32 = vpop.permute.xlu0 %116 }
  0xc7   :  { %vm118_vm7 = vcmp.eq.s32.totalorder %v69_v30, %v114_v26  ;;  %vm119_vm8 = vcmp.eq.s32.totalorder %v69_v30, %v117_v32  ;;  %v827_v32 = vld [vmem:[#allocation7 + $0x10] sm:$0xff]  }
  0xc8   :  { %v616_v43 = vsel %vm118_vm7, 1.0, %v934_v2  ;;  %v617_v44 = vsel %vm119_vm8, 1.0, %v934_v2 }
  0xc9   :  { %v124_v51 = vadd.f32 %v616_v43, %v110_v46  ;;  %v125_v52 = vadd.f32 %v617_v44, %v111_v45 }
  0xcb   :  { %v128_v28 = vpop.permute.xlu1 %127  ;;  %v142_v40 = vpop.permute.xlu0 %141 }
  0xcc   :  { %vm132_vm9 = vcmp.eq.s32.totalorder %v69_v30, %v128_v28  ;;  %vm146_vm12 = vcmp.eq.s32.totalorder %v69_v30, %v142_v40 }
  0xcd   :  { %v618_v48 = vsel %vm132_vm9, 1.0, %v934_v2  ;;  %v620_v56 = vsel %vm146_vm12, 1.0, %v934_v2 }
  0xce   :  { %v138_v54 = vadd.f32 %v618_v48, %v124_v51  ;;  %v830_v48 = vld [vmem:[#allocation7 + $0x28] sm:$0xff]  }
  0xcf   :  { %v131_v31 = vpop.permute.xlu1 %130 }
  0xd0   :  { %vm133_vm10 = vcmp.eq.s32.totalorder %v69_v30, %v131_v31  ;;  %v159_v50 = vpop.permute.xlu0 %158  ;;  %v152_v61 = vadd.f32 %v620_v56, %v138_v54  ;;  %v826_v31 = vld [vmem:[#allocation7 + $0x8] sm:$0xff]  }
  0xd1   :  { %v619_v49 = vsel %vm133_vm10, 1.0, %v934_v2  ;;  %vm161_vm13 = vcmp.eq.s32.totalorder %v69_v30, %v159_v50  ;;  %v832_v50 = vld [vmem:[#allocation7 + $0x38] sm:$0xff]  }
  0xd2   :  { %v139_v55 = vadd.f32 %v619_v49, %v125_v52  ;;  %v623_v59 = vsel %vm161_vm13, 1.0, %v934_v2  ;;  %v831_v49 = vld [vmem:[#allocation7 + $0x30] sm:$0xff]  }
  0xd4   :  { %v145_v37 = vpop.permute.xlu1 %144 }
  0xd5   :  { %vm147_vm11 = vcmp.eq.s32.totalorder %v69_v30, %v145_v37 }
  0xd6   :  { %v621_v53 = vsel %vm147_vm11, 1.0, %v934_v2 }
  0xd7   :  { %v153_v58 = vadd.f32 %v621_v53, %v139_v55 }
  0xd9   :  { %v156_v47 = vpop.permute.xlu1 %155  ;;  %v167_v0 = vadd.f32 %v623_v59, %v153_v58 }
  0xda   :  { %vm160_vm14 = vcmp.eq.s32.totalorder %v69_v30, %v156_v47 }
  0xdb   :  { %v622_v60 = vsel %vm160_vm14, 1.0, %v934_v2 }
  0xdc   :  { %v166_v1 = vadd.f32 %v622_v60, %v152_v61 }
  0xde   :  { %v170_v57 = vpop.permute.xlu1 %169 }
  0xdf   :  { %vm174_vm15 = vcmp.eq.s32.totalorder %v69_v30, %v170_v57 }
  0xe0   :  { %v624_v62 = vsel %vm174_vm15, 1.0, %v934_v2 }
  0xe1   :  { %v180_v4 = vadd.f32 %v624_v62, %v166_v1 }
  0xe2   :  { %v173_v63 = vpop.permute.xlu1 %172 }
  0xe3   :  { %vm175_vm1 = vcmp.eq.s32.totalorder %v69_v30, %v173_v63  ;;  %v825_v30 = vld [vmem:[#allocation7] sm:$0xff]  }
  0xe4   :  { %v625_v3 = vsel %vm175_vm1, 1.0, %v934_v2 }
  0xe5   :  { %v181_v5 = vadd.f32 %v625_v3, %v167_v0 }
  0xe7   :  { %v182_v6 = vpack.c.bf16 %v181_v5, %v180_v4 }
  0xe9   :  { %699 = vmatmul.mubr.msk.bf16.vlgmr.msra.gmra.mrb[0].mxu0 %vm215_vm2, %v182_v6 }
  0xea   :  { %723 = vmatpush3.bf16.msra.mxu0 %v1048_v15  ;;  %738 = vmatprep.mubr.msk.bf16.mxu0 %vm941_vm0, %v934_v2 }
  0xeb   :  { %724 = vmatprep.subr.bf16.mxu0 %v934_v2 }
  0xee   :  { %725 = vmatpush3.bf16.msra.mxu0 %v1051_v16 }
  0xef   :  { %726 = vmatprep.subr.bf16.mxu0 %v934_v2 }
  0xf2   :  { %727 = vmatpush3.bf16.msra.mxu0 %v1055_v17 }
  0xf3   :  { %728 = vmatprep.subr.bf16.mxu0 %v934_v2 }
  0xf6   :  { %729 = vmatpush3.bf16.msra.mxu0 %v1059_v18 }
  0xf7   :  { %730 = vmatprep.subr.bf16.mxu0 %v934_v2 }
  0xfa   :  { %731 = vmatpush3.bf16.msra.mxu0 %v1063_v19 }
  0xfb   :  { %732 = vmatprep.subr.bf16.mxu0 %v934_v2 }
  0xfe   :  { %733 = vmatpush3.bf16.msra.mxu0 %v1067_v20 }
  0xff   :  { %734 = vmatprep.subr.bf16.mxu0 %v934_v2 }
 0x102   :  { %735 = vmatpush3.bf16.msra.mxu0 %v823_v7 }
 0x103   :  { %736 = vmatprep.subr.bf16.mxu0 %v934_v2 }
 0x106   :  { %737 = vmatpush3.bf16.msra.mxu0 %v824_v8 }
 0x107   :  { %762 = vmatprep.subr.bf16.mxu0 %v934_v2 }
 0x1bc   :  { %v253_v9 = vpop.f32.mrb[0].mxu0 }
 0x1bd   :  { %v700_v10 = vpop.f32.mrb[1].mxu0  ;;  %v1106_v12 = vmul.f32 0.125, %v253_v9 }
 0x1be   :  { %v256_v11 = vpop.f32.mrb[2].mxu0 }
 0x1bf   :  { %v1108_v13 = vmul.f32 0.125, %v256_v11  ;;  %v701_v14 = vpop.f32.mrb[3].mxu0 }
 0x1c1   :  { %v285_v21 = vpack.c.bf16 %v1108_v13, %v1106_v12 }
 0x1c3   :  { %719 = vmatmul.mubr.bf16.vlgmr.msra.gmra.mrb[0].mxu1 %v285_v21 }
 0x1c4   :  { %743 = vmatpush3.bf16.msra.mxu1 %v1048_v15  ;;  %758 = vmatprep.mubr.msk.bf16.mxu1 %vm941_vm0, %v934_v2  ;;  %v631_v15 = vld [vmem:[%s1163_s3] ss:$0 sm:$0xff] }
 0x1c5   :  { %744 = vmatprep.subr.bf16.mxu1 %v934_v2 }
 0x1c8   :  { %745 = vmatpush3.bf16.msra.mxu1 %v1051_v16 }
 0x1c9   :  { %746 = vmatprep.subr.bf16.mxu1 %v934_v2 }
 0x1cc   :  { %747 = vmatpush3.bf16.msra.mxu1 %v1055_v17 }
 0x1cd   :  { %748 = vmatprep.subr.bf16.mxu1 %v934_v2 }
 0x1d0   :  { %749 = vmatpush3.bf16.msra.mxu1 %v1059_v18 }
 0x1d1   :  { %750 = vmatprep.subr.bf16.mxu1 %v934_v2 }
 0x1d4   :  { %751 = vmatpush3.bf16.msra.mxu1 %v1063_v19 }
 0x1d5   :  { %752 = vmatprep.subr.bf16.mxu1 %v934_v2 }
 0x1d8   :  { %753 = vmatpush3.bf16.msra.mxu1 %v1067_v20 }
 0x1d9   :  { %754 = vmatprep.subr.bf16.mxu1 %v934_v2 }
 0x1dc   :  { %755 = vmatpush3.bf16.msra.mxu1 %v823_v7 }
 0x1dd   :  { %756 = vmatprep.subr.bf16.mxu1 %v934_v2 }
 0x1e0   :  { %757 = vmatpush3.bf16.msra.mxu1 %v824_v8 }
 0x296   :  { %v368_v16 = vpop.f32.mrb[0].mxu1 }
 0x297   :  { %v369_v17 = vadd.f32 %v631_v15, %v368_v16  ;;  %v720_v18 = vpop.f32.mrb[1].mxu1 }
 0x298   :  { %v371_v22 = vpop.f32.mrb[2].mxu1 }
 0x299   :  { %v375_v23 = vmax.f32 %v369_v17, 0.0  ;;  %v372_v19 = vadd.f32 %v631_v15, %v371_v22  ;;  %v721_v24 = vpop.f32.mrb[3].mxu1 }
 0x29b   :  { %v377_v25 = vadd.f32 %v375_v23, %v1106_v12  ;;  %v376_v20 = vmax.f32 %v372_v19, 0.0 }
 0x29d   :  { %v378_v26 = vadd.f32 %v376_v20, %v1108_v13  ;;  %v379_v27 = vmax.f32 %v377_v25, 0.0 }
 0x29f   :  { %v380_v28 = vmax.f32 %v378_v26, 0.0 }
 0x2a1   :  { %v381_v29 = vpack.c.bf16 %v380_v28, %v379_v27 }
 0x2a3   :  { %739 = vmatmul.mubr.bf16.vlgmr.msra.gmra.mrb[4].mxu0 %v381_v29 }
 0x2a4   :  { %778 = vmatprep.mubr.msk.bf16.mxu0 %vm941_vm0, %v934_v2  ;;  %763 = vmatpush3.bf16.msra.mxu0 %v825_v30 }
 0x2a5   :  { %764 = vmatprep.subr.bf16.mxu0 %v934_v2 }
 0x2a8   :  { %765 = vmatpush3.bf16.msra.mxu0 %v826_v31 }
 0x2a9   :  { %766 = vmatprep.subr.bf16.mxu0 %v934_v2 }
 0x2ac   :  { %767 = vmatpush3.bf16.msra.mxu0 %v827_v32 }
 0x2ad   :  { %768 = vmatprep.subr.bf16.mxu0 %v934_v2 }
 0x2b0   :  { %769 = vmatpush3.bf16.msra.mxu0 %v828_v33 }
 0x2b1   :  { %770 = vmatprep.subr.bf16.mxu0 %v934_v2 }
 0x2b4   :  { %771 = vmatpush3.bf16.msra.mxu0 %v829_v34 }
 0x2b5   :  { %772 = vmatprep.subr.bf16.mxu0 %v934_v2 }
 0x2b8   :  { %773 = vmatpush3.bf16.msra.mxu0 %v830_v48 }
 0x2b9   :  { %774 = vmatprep.subr.bf16.mxu0 %v934_v2 }
 0x2bc   :  { %775 = vmatpush3.bf16.msra.mxu0 %v831_v49 }
 0x2bd   :  { %776 = vmatprep.subr.bf16.mxu0 %v934_v2  ;;  %v640_v2 = vld [vmem:[%s1165_s5] ss:$0 sm:$0xff] }
 0x2c0   :  { %777 = vmatpush3.bf16.msra.mxu0 %v832_v50 }
 0x376   :  { %v416_v35 = vpop.f32.mrb[4].mxu0 }
 0x377   :  { %v417_v36 = vadd.f32 %v631_v15, %v416_v35  ;;  %v740_v37 = vpop.f32.mrb[5].mxu0 }
 0x378   :  { %v419_v38 = vpop.f32.mrb[6].mxu0 }
 0x379   :  { %v423_v39 = vmax.f32 %v417_v36, 0.0  ;;  %v420_v40 = vadd.f32 %v631_v15, %v419_v38  ;;  %v741_v41 = vpop.f32.mrb[7].mxu0 }
 0x37b   :  { %v425_v42 = vadd.f32 %v423_v39, %v1106_v12  ;;  %v424_v43 = vmax.f32 %v420_v40, 0.0 }
 0x37d   :  { %v426_v44 = vadd.f32 %v424_v43, %v1108_v13  ;;  %v427_v45 = vmax.f32 %v425_v42, 0.0 }
 0x37f   :  { %v428_v46 = vmax.f32 %v426_v44, 0.0 }
 0x381   :  { %v429_v47 = vpack.c.bf16 %v428_v46, %v427_v45 }
 0x383   :  { %759 = vmatmul.mubr.bf16.vlgmr.msra.gmra.mrb[4].mxu1 %v429_v47 }
 0x456   :  { %v464_v51 = vpop.f32.mrb[4].mxu1 }
 0x457   :  { %v465_v52 = vadd.f32 %v631_v15, %v464_v51  ;;  %v760_v53 = vpop.f32.mrb[5].mxu1 }
 0x458   :  { %v467_v54 = vpop.f32.mrb[6].mxu1 }
 0x459   :  { %v471_v55 = vmax.f32 %v465_v52, 0.0  ;;  %v468_v56 = vadd.f32 %v631_v15, %v467_v54  ;;  %v761_v57 = vpop.f32.mrb[7].mxu1 }
 0x45b   :  { %v473_v58 = vadd.f32 %v471_v55, %v1106_v12  ;;  %v472_v59 = vmax.f32 %v468_v56, 0.0 }
 0x45d   :  { %v474_v60 = vadd.f32 %v472_v59, %v1108_v13  ;;  %v475_v61 = vmax.f32 %v473_v58, 0.0 }
 0x45f   :  { %v476_v62 = vmax.f32 %v474_v60, 0.0 }
 0x461   :  { %v477_v63 = vpack.c.bf16 %v476_v62, %v475_v61 }
 0x463   :  { %779 = vmatmul.mubr.bf16.vlgmr.msra.gmra.mrb[8].mxu0 %v477_v63 }
 0x536   :  { %v583_v0 = vpop.f32.mrb[8].mxu0 }
 0x537   :  { %v584_v1 = vadd.f32 %v640_v2, %v583_v0  ;;  %v780_v3 = vpop.f32.mrb[9].mxu0 }
 0x538   :  { %v586_v4 = vpop.f32.mrb[10].mxu0 }
 0x539   :  { %590 = vst [vmem:[#allocation8] sm:$0xff] %v584_v1  ;;  %v587_v5 = vadd.f32 %v640_v2, %v586_v4  ;;  %v781_v6 = vpop.f32.mrb[11].mxu0 }
 0x53b   :  { %591 = vst [vmem:[#allocation8 + $0x8] sm:$0xff] %v587_v5 }
 0x53c   :  { %910 = shalt.err (!%p907_p0)
}
 0x53d   :  { %s911_s18 = scalar_lea.hbm %s1166_s6, 256 }
 0x53e   :  { %p912_p1 = scmp.ne.s32.totalorder %s1166_s6, %s911_s18  ;;  %p915_p2 = scmp.lt.u32.totalorder %s911_s18, %s1166_s6 }
 0x540   :  { %p917_p3 = pnand %p915_p2, %p912_p1 }
 0x542   :  { %920 = shalt.err (!%p917_p3)
}
 0x543   :  { %s943_s22 = smov 128   ;;  %s944_s23 = smov 8  }
 0x544   :  { %603 = dma.vmem_to_hbm [thread:$0]  %s598_s15, 256, %s1166_s6, [#allocation4], %s943_s22, %s943_s22, %s944_s23  }
 0x545   :  { %925 = dma.done.wait [#allocation4], 256  }
 0x546   :  { %926 = vsyncadd [#allocation4], 4294967040 }
 0x547   :  { %607 = vsyncpa [#allocation3], 1 }
 0x548   :  { %608 = vsyncpa [#allocation6], 1 }
 0x549   :  { %609 = vsyncpa [#allocation4], 1 }

</bundles_post_ra>
